<compile_context>
chip_gen: v6e
topology: v6e:2x2x1
jax: 0.10.0
libtpu: 0.0.40
codegen_flags: <defaults>
</compile_context>

<pallas_src>
import functools

import jax
import jax.numpy as jnp
from jax import lax
from jax.experimental import pallas as pl
from jax.experimental.pallas import tpu as pltpu


def _round_up(a, b):
    return (a + b - 1) // b * b


def _pick_bh(H, W, max_rows):
    """Largest divisor of H with bh*W rows per matmul tile <= max_rows."""
    best = 1
    for d in range(1, H + 1):
        if H % d == 0 and d * W <= max_rows:
            best = d
    return best


def _phase_conv_kernel(x_ref, w_ref, b_ref, o_ref, acc_ref, *,
                       bh, w_cols, n_c, nout, tu_h, tu_w):
    """One (image n, row-block hb) step.

    x_ref : (1, Hp, Wp, C)        padded NHWC plane of image n (VMEM resident)
    w_ref : (Tu, Tu, C, NOUT)     per-tap folded weights, NOUT = s*s*Co_pad
    b_ref : (1, NOUT)             packed bias (f32)
    o_ref : (1, bh, W, NOUT)      packed phase outputs for this row block
    acc_ref: (bh*W, NOUT) f32     VMEM accumulator
    """
    r0 = pl.multiple_of(pl.program_id(1) * bh, bh)

    first = True
    for ty in range(tu_h):            # static tap loop: contraction over C only,
        for tx in range(tu_w):        # tap accumulation into f32 VMEM scratch
            slab = x_ref[0, pl.ds(r0 + ty, bh), pl.ds(tx, w_cols), :]
            slab = slab.reshape(bh * w_cols, n_c)
            contrib = jnp.dot(slab, w_ref[ty, tx],
                              preferred_element_type=jnp.float32)
            if first:
                acc_ref[...] = contrib
                first = False
            else:
                acc_ref[...] += contrib

    result = acc_ref[...] + b_ref[...].astype(jnp.float32)
    o_ref[...] = result.reshape(1, bh, w_cols, nout).astype(o_ref.dtype)


def resize_conv_forward(x, weight, bias, *, scale_factor=2,
                        compute_dtype=jnp.bfloat16, max_rows_per_tile=1024):
    """x: (N, C, H, W) NCHW; weight: (Co, C, kh, kw); bias: (Co,)."""
    N, C, H, W = x.shape
    Co, Ci, kh, kw = weight.shape
    assert Ci == C
    assert kh % 2 == 1 and kw % 2 == 1, "'same' padding requires odd kernels"
    s = int(scale_factor)
    assert s >= 1
    # TODO(synk): stride!=1, dilation!=1, groups!=1 and output_size-based
    # resizing are not implemented (these are not the ResizeConvBase defaults).

    ph, pw = kh // 2, kw // 2
    # Per-phase reduced tap window (union over phases), at ORIGINAL resolution.
    rmin_h, rmax_h = (0 - ph) // s, (s - 1 + kh - 1 - ph) // s
    rmin_w, rmax_w = (0 - pw) // s, (s - 1 + kw - 1 - pw) // s
    tu_h, tu_w = rmax_h - rmin_h + 1, rmax_w - rmin_w + 1

    # Lane-dense packed output channels: NOUT = s*s*Co_pad, multiple of 128.
    if 128 % (s * s) == 0:
        co_p = _round_up(Co, max(1, 128 // (s * s)))
    else:
        co_p = _round_up(Co, 8)
    nout = s * s * co_p

    # ---- fold nearest-upsample + conv into per-phase reduced weights (f32) ----
    w32 = weight.astype(jnp.float32)
    wf = jnp.zeros((tu_h, tu_w, C, s, s, co_p), jnp.float32)
    for dy in range(kh):
        for dx in range(kw):
            wtap = w32[:, :, dy, dx].T                      # (C, Co)
            for pi in range(s):
                ty = (pi + dy - ph) // s - rmin_h
                for pj in range(s):
                    tx = (pj + dx - pw) // s - rmin_w
                    wf = wf.at[ty, tx, :, pi, pj, :Co].add(wtap)
    w_packed = wf.reshape(tu_h, tu_w, C, nout).astype(compute_dtype)
    b_packed = (jnp.zeros((s, s, co_p), jnp.float32)
                .at[:, :, :Co].set(bias.astype(jnp.float32))
                .reshape(1, nout))

    # ---- NHWC + replicate ('edge') pad at ORIGINAL resolution (no upsample) ----
    xh = jnp.transpose(x, (0, 2, 3, 1))                     # (N, H, W, C)
    xpad = jnp.pad(xh, ((0, 0), (-rmin_h, rmax_h), (-rmin_w, rmax_w), (0, 0)),
                   mode="edge").astype(compute_dtype)
    Hp, Wp = H + tu_h - 1, W + tu_w - 1

    bh = _pick_bh(H, W, max_rows_per_tile)
    grid = (N, H // bh)

    kernel = functools.partial(_phase_conv_kernel, bh=bh, w_cols=W, n_c=C,
                               nout=nout, tu_h=tu_h, tu_w=tu_w)

    flops = 2 * N * H * W * C * tu_h * tu_w * nout
    bytes_accessed = (xpad.size * xpad.dtype.itemsize
                      + w_packed.size * w_packed.dtype.itemsize
                      + b_packed.size * 4
                      + N * H * W * nout * x.dtype.itemsize)

    out = pl.pallas_call(
        kernel,
        out_shape=jax.ShapeDtypeStruct((N, H, W, nout), x.dtype),
        grid_spec=pltpu.PrefetchScalarGridSpec(
            num_scalar_prefetch=0,
            grid=grid,
            in_specs=[
                # Whole padded plane of image n stays VMEM-resident across the
                # row-block axis (same block index -> no re-DMA); taps are
                # gathered in-kernel with static/dynamic slices (no im2col).
                pl.BlockSpec((1, Hp, Wp, C), lambda n, h: (n, 0, 0, 0)),
                pl.BlockSpec((tu_h, tu_w, C, nout), lambda n, h: (0, 0, 0, 0)),
                pl.BlockSpec((1, nout), lambda n, h: (0, 0)),
            ],
            out_specs=pl.BlockSpec((1, bh, W, nout), lambda n, h: (n, h, 0, 0)),
            scratch_shapes=[pltpu.VMEM((bh * W, nout), jnp.float32)],
        ),
        compiler_params=pltpu.CompilerParams(
            dimension_semantics=("parallel", "parallel")),
        cost_estimate=pl.CostEstimate(flops=flops, transcendentals=0,
                                      bytes_accessed=bytes_accessed),
    )(xpad, w_packed, b_packed)

    # Depth-to-space + NCHW in ONE transpose (module boundary is NCHW).
    out = out.reshape(N, H, W, s, s, co_p)[..., :Co]
    out = out.transpose(0, 5, 1, 3, 2, 4).reshape(N, Co, H * s, W * s)
    return out


def _reference(x, weight, bias, *, scale_factor=2):
    """Pure-JAX reference mirroring the PyTorch module."""
    kh, kw = weight.shape[2], weight.shape[3]
    xu = jnp.repeat(jnp.repeat(x, scale_factor, axis=2), scale_factor, axis=3)
    xp = jnp.pad(xu, ((0, 0), (0, 0), (kh // 2, kh // 2), (kw // 2, kw // 2)),
                 mode="edge")
    y = lax.conv_general_dilated(
        xp, weight, window_strides=(1, 1), padding="VALID",
        dimension_numbers=("NCHW", "OIHW", "NCHW"))
    return y + bias[None, :, None, None]


if __name__ == "__main__":
    N, C, H, W = 2, 4, 16, 16
    Co, k, s = 8, 3, 2

    key = jax.random.PRNGKey(0)
    kx, kw_, kb = jax.random.split(key, 3)

    x = jax.random.normal(kx, (N, C, H, W), dtype=jnp.float32)
    fan_in = C * k * k
    bound = 1.0 / (fan_in ** 0.5)
    weight = jax.random.uniform(kw_, (Co, C, k, k), minval=-bound, maxval=bound,
                                dtype=jnp.float32)
    bias = jax.random.uniform(kb, (Co,), minval=-bound, maxval=bound,
                              dtype=jnp.float32)

    ref = jax.block_until_ready(_reference(x, weight, bias, scale_factor=s))

    # Strict semantic check with f32 operands.
    out_f32 = jax.block_until_ready(
        resize_conv_forward(x, weight, bias, scale_factor=s,
                            compute_dtype=jnp.float32))
    assert out_f32.shape == (N, Co, H * s, W * s), out_f32.shape
    assert jnp.allclose(out_f32, ref, atol=1e-4, rtol=1e-4), float(
        jnp.max(jnp.abs(out_f32 - ref)))

    # Default fast path: bf16 MXU operands, f32 accumulation.
    out_bf16 = jax.block_until_ready(
        resize_conv_forward(x, weight, bias, scale_factor=s))
    assert out_bf16.shape == (N, Co, H * s, W * s), out_bf16.shape
    err = float(jnp.max(jnp.abs(out_bf16 - ref)))
    assert err < 0.15, err

    print("KERNEL_OK")
</pallas_src>

<mosaic_0001>
module attributes {stable_mosaic.version = 11 : i64} {
  func.func @_phase_conv_kernel(%arg0: i32, %arg1: i32, %arg2: memref<1x18x18x4xf32, #tpu.memory_space<vmem>>, %arg3: memref<3x3x4x128xf32, #tpu.memory_space<vmem>>, %arg4: memref<1x128xf32, #tpu.memory_space<vmem>>, %arg5: memref<1x16x16x128xf32, #tpu.memory_space<vmem>>, %arg6: memref<256x128xf32, #tpu.memory_space<vmem>>) attributes {dimension_semantics = [#tpu.dimension_semantics<parallel>, #tpu.dimension_semantics<parallel>], iteration_bounds = array<i64: 2, 1>, scalar_prefetch = 0 : i64, scratch_operands = 1 : i64, tpu.core_type = #tpu.core_type<tc>, window_params = [{transform_indices = @transform_0, window_bounds = array<i64: 1, 18, 18, 4>}, {pipeline_mode = #tpu.pipeline_mode<synchronous>, transform_indices = @transform_1, window_bounds = array<i64: 3, 3, 4, 128>}, {pipeline_mode = #tpu.pipeline_mode<synchronous>, transform_indices = @transform_2, window_bounds = array<i64: 1, 128>}, {transform_indices = @transform_3, window_bounds = array<i64: 1, 16, 16, 128>}]} {
    %c16_i32 = arith.constant 16 : i32
    %0 = arith.muli %arg1, %c16_i32 : i32
    %1 = tpu.assume_multiple %0, 16 : i32
    %c0_i32 = arith.constant 0 : i32
    %2 = arith.addi %1, %c0_i32 : i32
    %c0 = arith.constant 0 : index
    %3 = arith.index_cast %2 : i32 to index
    %c0_0 = arith.constant 0 : index
    %c0_1 = arith.constant 0 : index
    %4 = vector.load %arg2[%c0, %3, %c0_0, %c0_1] : memref<1x18x18x4xf32, #tpu.memory_space<vmem>>, vector<1x16x16x4xf32>
    %5 = vector.shape_cast %4 : vector<1x16x16x4xf32> to vector<16x16x4xf32>
    %6 = vector.shape_cast %5 : vector<16x16x4xf32> to vector<256x4xf32>
    %c0_2 = arith.constant 0 : index
    %c0_3 = arith.constant 0 : index
    %c0_4 = arith.constant 0 : index
    %c0_5 = arith.constant 0 : index
    %7 = vector.load %arg3[%c0_2, %c0_3, %c0_4, %c0_5] : memref<3x3x4x128xf32, #tpu.memory_space<vmem>>, vector<1x1x4x128xf32>
    %8 = vector.shape_cast %7 : vector<1x1x4x128xf32> to vector<4x128xf32>
    %cst = arith.constant dense<0.000000e+00> : vector<256x128xf32>
    %9 = tpu.matmul %6, %8, %cst {dimension_numbers = #tpu.dot_dimension_numbers<[1], [0], [0], [1], [0, 0, 1, 1], [], []>} : vector<256x4xf32>, vector<4x128xf32>, vector<256x128xf32> -> vector<256x128xf32>
    %c0_6 = arith.constant 0 : index
    %c0_7 = arith.constant 0 : index
    %10 = vector.load %arg6[%c0_6, %c0_7] : memref<256x128xf32, #tpu.memory_space<vmem>>, vector<256x128xf32>
    tpu.vector_store %arg6[%c0_6, %c0_7], %9 {strides = array<i32>} : memref<256x128xf32, #tpu.memory_space<vmem>>, vector<256x128xf32>,
    %c0_i32_8 = arith.constant 0 : i32
    %11 = arith.addi %1, %c0_i32_8 : i32
    %c0_9 = arith.constant 0 : index
    %12 = arith.index_cast %11 : i32 to index
    %c1 = arith.constant 1 : index
    %c0_10 = arith.constant 0 : index
    %13 = vector.load %arg2[%c0_9, %12, %c1, %c0_10] : memref<1x18x18x4xf32, #tpu.memory_space<vmem>>, vector<1x16x16x4xf32>
    %14 = vector.shape_cast %13 : vector<1x16x16x4xf32> to vector<16x16x4xf32>
    %15 = vector.shape_cast %14 : vector<16x16x4xf32> to vector<256x4xf32>
    %c0_11 = arith.constant 0 : index
    %c1_12 = arith.constant 1 : index
    %c0_13 = arith.constant 0 : index
    %c0_14 = arith.constant 0 : index
    %16 = vector.load %arg3[%c0_11, %c1_12, %c0_13, %c0_14] : memref<3x3x4x128xf32, #tpu.memory_space<vmem>>, vector<1x1x4x128xf32>
    %17 = vector.shape_cast %16 : vector<1x1x4x128xf32> to vector<4x128xf32>
    %cst_15 = arith.constant dense<0.000000e+00> : vector<256x128xf32>
    %18 = tpu.matmul %15, %17, %cst_15 {dimension_numbers = #tpu.dot_dimension_numbers<[1], [0], [0], [1], [0, 0, 1, 1], [], []>} : vector<256x4xf32>, vector<4x128xf32>, vector<256x128xf32> -> vector<256x128xf32>
    %c0_16 = arith.constant 0 : index
    %c0_17 = arith.constant 0 : index
    %19 = vector.load %arg6[%c0_16, %c0_17] : memref<256x128xf32, #tpu.memory_space<vmem>>, vector<256x128xf32>
    %20 = arith.addf %19, %18 : vector<256x128xf32>
    %c0_18 = arith.constant 0 : index
    %c0_19 = arith.constant 0 : index
    %21 = vector.load %arg6[%c0_18, %c0_19] : memref<256x128xf32, #tpu.memory_space<vmem>>, vector<256x128xf32>
    tpu.vector_store %arg6[%c0_18, %c0_19], %20 {strides = array<i32>} : memref<256x128xf32, #tpu.memory_space<vmem>>, vector<256x128xf32>,
    %c0_i32_20 = arith.constant 0 : i32
    %22 = arith.addi %1, %c0_i32_20 : i32
    %c0_21 = arith.constant 0 : index
    %23 = arith.index_cast %22 : i32 to index
    %c2 = arith.constant 2 : index
    %c0_22 = arith.constant 0 : index
    %24 = vector.load %arg2[%c0_21, %23, %c2, %c0_22] : memref<1x18x18x4xf32, #tpu.memory_space<vmem>>, vector<1x16x16x4xf32>
    %25 = vector.shape_cast %24 : vector<1x16x16x4xf32> to vector<16x16x4xf32>
    %26 = vector.shape_cast %25 : vector<16x16x4xf32> to vector<256x4xf32>
    %c0_23 = arith.constant 0 : index
    %c2_24 = arith.constant 2 : index
    %c0_25 = arith.constant 0 : index
    %c0_26 = arith.constant 0 : index
    %27 = vector.load %arg3[%c0_23, %c2_24, %c0_25, %c0_26] : memref<3x3x4x128xf32, #tpu.memory_space<vmem>>, vector<1x1x4x128xf32>
    %28 = vector.shape_cast %27 : vector<1x1x4x128xf32> to vector<4x128xf32>
    %cst_27 = arith.constant dense<0.000000e+00> : vector<256x128xf32>
    %29 = tpu.matmul %26, %28, %cst_27 {dimension_numbers = #tpu.dot_dimension_numbers<[1], [0], [0], [1], [0, 0, 1, 1], [], []>} : vector<256x4xf32>, vector<4x128xf32>, vector<256x128xf32> -> vector<256x128xf32>
    %c0_28 = arith.constant 0 : index
    %c0_29 = arith.constant 0 : index
    %30 = vector.load %arg6[%c0_28, %c0_29] : memref<256x128xf32, #tpu.memory_space<vmem>>, vector<256x128xf32>
    %31 = arith.addf %30, %29 : vector<256x128xf32>
    %c0_30 = arith.constant 0 : index
    %c0_31 = arith.constant 0 : index
    %32 = vector.load %arg6[%c0_30, %c0_31] : memref<256x128xf32, #tpu.memory_space<vmem>>, vector<256x128xf32>
    tpu.vector_store %arg6[%c0_30, %c0_31], %31 {strides = array<i32>} : memref<256x128xf32, #tpu.memory_space<vmem>>, vector<256x128xf32>,
    %c1_i32 = arith.constant 1 : i32
    %33 = arith.addi %1, %c1_i32 : i32
    %c0_32 = arith.constant 0 : index
    %34 = arith.index_cast %33 : i32 to index
    %c0_33 = arith.constant 0 : index
    %c0_34 = arith.constant 0 : index
    %35 = vector.load %arg2[%c0_32, %34, %c0_33, %c0_34] : memref<1x18x18x4xf32, #tpu.memory_space<vmem>>, vector<1x16x16x4xf32>
    %36 = vector.shape_cast %35 : vector<1x16x16x4xf32> to vector<16x16x4xf32>
    %37 = vector.shape_cast %36 : vector<16x16x4xf32> to vector<256x4xf32>
    %c1_35 = arith.constant 1 : index
    %c0_36 = arith.constant 0 : index
    %c0_37 = arith.constant 0 : index
    %c0_38 = arith.constant 0 : index
    %38 = vector.load %arg3[%c1_35, %c0_36, %c0_37, %c0_38] : memref<3x3x4x128xf32, #tpu.memory_space<vmem>>, vector<1x1x4x128xf32>
    %39 = vector.shape_cast %38 : vector<1x1x4x128xf32> to vector<4x128xf32>
    %cst_39 = arith.constant dense<0.000000e+00> : vector<256x128xf32>
    %40 = tpu.matmul %37, %39, %cst_39 {dimension_numbers = #tpu.dot_dimension_numbers<[1], [0], [0], [1], [0, 0, 1, 1], [], []>} : vector<256x4xf32>, vector<4x128xf32>, vector<256x128xf32> -> vector<256x128xf32>
    %c0_40 = arith.constant 0 : index
    %c0_41 = arith.constant 0 : index
    %41 = vector.load %arg6[%c0_40, %c0_41] : memref<256x128xf32, #tpu.memory_space<vmem>>, vector<256x128xf32>
    %42 = arith.addf %41, %40 : vector<256x128xf32>
    %c0_42 = arith.constant 0 : index
    %c0_43 = arith.constant 0 : index
    %43 = vector.load %arg6[%c0_42, %c0_43] : memref<256x128xf32, #tpu.memory_space<vmem>>, vector<256x128xf32>
    tpu.vector_store %arg6[%c0_42, %c0_43], %42 {strides = array<i32>} : memref<256x128xf32, #tpu.memory_space<vmem>>, vector<256x128xf32>,
    %c1_i32_44 = arith.constant 1 : i32
    %44 = arith.addi %1, %c1_i32_44 : i32
    %c0_45 = arith.constant 0 : index
    %45 = arith.index_cast %44 : i32 to index
    %c1_46 = arith.constant 1 : index
    %c0_47 = arith.constant 0 : index
    %46 = vector.load %arg2[%c0_45, %45, %c1_46, %c0_47] : memref<1x18x18x4xf32, #tpu.memory_space<vmem>>, vector<1x16x16x4xf32>
    %47 = vector.shape_cast %46 : vector<1x16x16x4xf32> to vector<16x16x4xf32>
    %48 = vector.shape_cast %47 : vector<16x16x4xf32> to vector<256x4xf32>
    %c1_48 = arith.constant 1 : index
    %c1_49 = arith.constant 1 : index
    %c0_50 = arith.constant 0 : index
    %c0_51 = arith.constant 0 : index
    %49 = vector.load %arg3[%c1_48, %c1_49, %c0_50, %c0_51] : memref<3x3x4x128xf32, #tpu.memory_space<vmem>>, vector<1x1x4x128xf32>
    %50 = vector.shape_cast %49 : vector<1x1x4x128xf32> to vector<4x128xf32>
    %cst_52 = arith.constant dense<0.000000e+00> : vector<256x128xf32>
    %51 = tpu.matmul %48, %50, %cst_52 {dimension_numbers = #tpu.dot_dimension_numbers<[1], [0], [0], [1], [0, 0, 1, 1], [], []>} : vector<256x4xf32>, vector<4x128xf32>, vector<256x128xf32> -> vector<256x128xf32>
    %c0_53 = arith.constant 0 : index
    %c0_54 = arith.constant 0 : index
    %52 = vector.load %arg6[%c0_53, %c0_54] : memref<256x128xf32, #tpu.memory_space<vmem>>, vector<256x128xf32>
    %53 = arith.addf %52, %51 : vector<256x128xf32>
    %c0_55 = arith.constant 0 : index
    %c0_56 = arith.constant 0 : index
    %54 = vector.load %arg6[%c0_55, %c0_56] : memref<256x128xf32, #tpu.memory_space<vmem>>, vector<256x128xf32>
    tpu.vector_store %arg6[%c0_55, %c0_56], %53 {strides = array<i32>} : memref<256x128xf32, #tpu.memory_space<vmem>>, vector<256x128xf32>,
    %c1_i32_57 = arith.constant 1 : i32
    %55 = arith.addi %1, %c1_i32_57 : i32
    %c0_58 = arith.constant 0 : index
    %56 = arith.index_cast %55 : i32 to index
    %c2_59 = arith.constant 2 : index
    %c0_60 = arith.constant 0 : index
    %57 = vector.load %arg2[%c0_58, %56, %c2_59, %c0_60] : memref<1x18x18x4xf32, #tpu.memory_space<vmem>>, vector<1x16x16x4xf32>
    %58 = vector.shape_cast %57 : vector<1x16x16x4xf32> to vector<16x16x4xf32>
    %59 = vector.shape_cast %58 : vector<16x16x4xf32> to vector<256x4xf32>
    %c1_61 = arith.constant 1 : index
    %c2_62 = arith.constant 2 : index
    %c0_63 = arith.constant 0 : index
    %c0_64 = arith.constant 0 : index
    %60 = vector.load %arg3[%c1_61, %c2_62, %c0_63, %c0_64] : memref<3x3x4x128xf32, #tpu.memory_space<vmem>>, vector<1x1x4x128xf32>
    %61 = vector.shape_cast %60 : vector<1x1x4x128xf32> to vector<4x128xf32>
    %cst_65 = arith.constant dense<0.000000e+00> : vector<256x128xf32>
    %62 = tpu.matmul %59, %61, %cst_65 {dimension_numbers = #tpu.dot_dimension_numbers<[1], [0], [0], [1], [0, 0, 1, 1], [], []>} : vector<256x4xf32>, vector<4x128xf32>, vector<256x128xf32> -> vector<256x128xf32>
    %c0_66 = arith.constant 0 : index
    %c0_67 = arith.constant 0 : index
    %63 = vector.load %arg6[%c0_66, %c0_67] : memref<256x128xf32, #tpu.memory_space<vmem>>, vector<256x128xf32>
    %64 = arith.addf %63, %62 : vector<256x128xf32>
    %c0_68 = arith.constant 0 : index
    %c0_69 = arith.constant 0 : index
    %65 = vector.load %arg6[%c0_68, %c0_69] : memref<256x128xf32, #tpu.memory_space<vmem>>, vector<256x128xf32>
    tpu.vector_store %arg6[%c0_68, %c0_69], %64 {strides = array<i32>} : memref<256x128xf32, #tpu.memory_space<vmem>>, vector<256x128xf32>,
    %c2_i32 = arith.constant 2 : i32
    %66 = arith.addi %1, %c2_i32 : i32
    %c0_70 = arith.constant 0 : index
    %67 = arith.index_cast %66 : i32 to index
    %c0_71 = arith.constant 0 : index
    %c0_72 = arith.constant 0 : index
    %68 = vector.load %arg2[%c0_70, %67, %c0_71, %c0_72] : memref<1x18x18x4xf32, #tpu.memory_space<vmem>>, vector<1x16x16x4xf32>
    %69 = vector.shape_cast %68 : vector<1x16x16x4xf32> to vector<16x16x4xf32>
    %70 = vector.shape_cast %69 : vector<16x16x4xf32> to vector<256x4xf32>
    %c2_73 = arith.constant 2 : index
    %c0_74 = arith.constant 0 : index
    %c0_75 = arith.constant 0 : index
    %c0_76 = arith.constant 0 : index
    %71 = vector.load %arg3[%c2_73, %c0_74, %c0_75, %c0_76] : memref<3x3x4x128xf32, #tpu.memory_space<vmem>>, vector<1x1x4x128xf32>
    %72 = vector.shape_cast %71 : vector<1x1x4x128xf32> to vector<4x128xf32>
    %cst_77 = arith.constant dense<0.000000e+00> : vector<256x128xf32>
    %73 = tpu.matmul %70, %72, %cst_77 {dimension_numbers = #tpu.dot_dimension_numbers<[1], [0], [0], [1], [0, 0, 1, 1], [], []>} : vector<256x4xf32>, vector<4x128xf32>, vector<256x128xf32> -> vector<256x128xf32>
    %c0_78 = arith.constant 0 : index
    %c0_79 = arith.constant 0 : index
    %74 = vector.load %arg6[%c0_78, %c0_79] : memref<256x128xf32, #tpu.memory_space<vmem>>, vector<256x128xf32>
    %75 = arith.addf %74, %73 : vector<256x128xf32>
    %c0_80 = arith.constant 0 : index
    %c0_81 = arith.constant 0 : index
    %76 = vector.load %arg6[%c0_80, %c0_81] : memref<256x128xf32, #tpu.memory_space<vmem>>, vector<256x128xf32>
    tpu.vector_store %arg6[%c0_80, %c0_81], %75 {strides = array<i32>} : memref<256x128xf32, #tpu.memory_space<vmem>>, vector<256x128xf32>,
    %c2_i32_82 = arith.constant 2 : i32
    %77 = arith.addi %1, %c2_i32_82 : i32
    %c0_83 = arith.constant 0 : index
    %78 = arith.index_cast %77 : i32 to index
    %c1_84 = arith.constant 1 : index
    %c0_85 = arith.constant 0 : index
    %79 = vector.load %arg2[%c0_83, %78, %c1_84, %c0_85] : memref<1x18x18x4xf32, #tpu.memory_space<vmem>>, vector<1x16x16x4xf32>
    %80 = vector.shape_cast %79 : vector<1x16x16x4xf32> to vector<16x16x4xf32>
    %81 = vector.shape_cast %80 : vector<16x16x4xf32> to vector<256x4xf32>
    %c2_86 = arith.constant 2 : index
    %c1_87 = arith.constant 1 : index
    %c0_88 = arith.constant 0 : index
    %c0_89 = arith.constant 0 : index
    %82 = vector.load %arg3[%c2_86, %c1_87, %c0_88, %c0_89] : memref<3x3x4x128xf32, #tpu.memory_space<vmem>>, vector<1x1x4x128xf32>
    %83 = vector.shape_cast %82 : vector<1x1x4x128xf32> to vector<4x128xf32>
    %cst_90 = arith.constant dense<0.000000e+00> : vector<256x128xf32>
    %84 = tpu.matmul %81, %83, %cst_90 {dimension_numbers = #tpu.dot_dimension_numbers<[1], [0], [0], [1], [0, 0, 1, 1], [], []>} : vector<256x4xf32>, vector<4x128xf32>, vector<256x128xf32> -> vector<256x128xf32>
    %c0_91 = arith.constant 0 : index
    %c0_92 = arith.constant 0 : index
    %85 = vector.load %arg6[%c0_91, %c0_92] : memref<256x128xf32, #tpu.memory_space<vmem>>, vector<256x128xf32>
    %86 = arith.addf %85, %84 : vector<256x128xf32>
    %c0_93 = arith.constant 0 : index
    %c0_94 = arith.constant 0 : index
    %87 = vector.load %arg6[%c0_93, %c0_94] : memref<256x128xf32, #tpu.memory_space<vmem>>, vector<256x128xf32>
    tpu.vector_store %arg6[%c0_93, %c0_94], %86 {strides = array<i32>} : memref<256x128xf32, #tpu.memory_space<vmem>>, vector<256x128xf32>,
    %c2_i32_95 = arith.constant 2 : i32
    %88 = arith.addi %1, %c2_i32_95 : i32
    %c0_96 = arith.constant 0 : index
    %89 = arith.index_cast %88 : i32 to index
    %c2_97 = arith.constant 2 : index
    %c0_98 = arith.constant 0 : index
    %90 = vector.load %arg2[%c0_96, %89, %c2_97, %c0_98] : memref<1x18x18x4xf32, #tpu.memory_space<vmem>>, vector<1x16x16x4xf32>
    %91 = vector.shape_cast %90 : vector<1x16x16x4xf32> to vector<16x16x4xf32>
    %92 = vector.shape_cast %91 : vector<16x16x4xf32> to vector<256x4xf32>
    %c2_99 = arith.constant 2 : index
    %c2_100 = arith.constant 2 : index
    %c0_101 = arith.constant 0 : index
    %c0_102 = arith.constant 0 : index
    %93 = vector.load %arg3[%c2_99, %c2_100, %c0_101, %c0_102] : memref<3x3x4x128xf32, #tpu.memory_space<vmem>>, vector<1x1x4x128xf32>
    %94 = vector.shape_cast %93 : vector<1x1x4x128xf32> to vector<4x128xf32>
    %cst_103 = arith.constant dense<0.000000e+00> : vector<256x128xf32>
    %95 = tpu.matmul %92, %94, %cst_103 {dimension_numbers = #tpu.dot_dimension_numbers<[1], [0], [0], [1], [0, 0, 1, 1], [], []>} : vector<256x4xf32>, vector<4x128xf32>, vector<256x128xf32> -> vector<256x128xf32>
    %c0_104 = arith.constant 0 : index
    %c0_105 = arith.constant 0 : index
    %96 = vector.load %arg6[%c0_104, %c0_105] : memref<256x128xf32, #tpu.memory_space<vmem>>, vector<256x128xf32>
    %97 = arith.addf %96, %95 : vector<256x128xf32>
    %c0_106 = arith.constant 0 : index
    %c0_107 = arith.constant 0 : index
    %98 = vector.load %arg6[%c0_106, %c0_107] : memref<256x128xf32, #tpu.memory_space<vmem>>, vector<256x128xf32>
    tpu.vector_store %arg6[%c0_106, %c0_107], %97 {strides = array<i32>} : memref<256x128xf32, #tpu.memory_space<vmem>>, vector<256x128xf32>,
    %c0_108 = arith.constant 0 : index
    %c0_109 = arith.constant 0 : index
    %99 = vector.load %arg6[%c0_108, %c0_109] : memref<256x128xf32, #tpu.memory_space<vmem>>, vector<256x128xf32>
    %c0_110 = arith.constant 0 : index
    %c0_111 = arith.constant 0 : index
    %100 = vector.load %arg4[%c0_110, %c0_111] : memref<1x128xf32, #tpu.memory_space<vmem>>, vector<1x128xf32>
    %101 = vector.broadcast %100 : vector<1x128xf32> to vector<256x128xf32>
    %102 = arith.addf %99, %101 : vector<256x128xf32>
    %103 = vector.shape_cast %102 : vector<256x128xf32> to vector<1x16x16x128xf32>
    %c0_112 = arith.constant 0 : index
    %c0_113 = arith.constant 0 : index
    %c0_114 = arith.constant 0 : index
    %c0_115 = arith.constant 0 : index
    %104 = vector.load %arg5[%c0_112, %c0_113, %c0_114, %c0_115] : memref<1x16x16x128xf32, #tpu.memory_space<vmem>>, vector<1x16x16x128xf32>
    tpu.vector_store %arg5[%c0_112, %c0_113, %c0_114, %c0_115], %103 {strides = array<i32>} : memref<1x16x16x128xf32, #tpu.memory_space<vmem>>, vector<1x16x16x128xf32>,
    return
  }
  func.func @transform_0(%arg0: i32, %arg1: i32) -> (i32, i32, i32, i32) {
    %c0_i32 = arith.constant 0 : i32
    %c0_i32_0 = arith.constant 0 : i32
    %c0_i32_1 = arith.constant 0 : i32
    %c0_i32_2 = arith.constant 0 : i32
    return %arg0, %c0_i32, %c0_i32_0, %c0_i32_1 : i32, i32, i32, i32
  }
  func.func @transform_1(%arg0: i32, %arg1: i32) -> (i32, i32, i32, i32) {
    %c0_i32 = arith.constant 0 : i32
    %c0_i32_0 = arith.constant 0 : i32
    %c0_i32_1 = arith.constant 0 : i32
    %c0_i32_2 = arith.constant 0 : i32
    %c0_i32_3 = arith.constant 0 : i32
    return %c0_i32, %c0_i32_0, %c0_i32_1, %c0_i32_2 : i32, i32, i32, i32
  }
  func.func @transform_2(%arg0: i32, %arg1: i32) -> (i32, i32) {
    %c0_i32 = arith.constant 0 : i32
    %c0_i32_0 = arith.constant 0 : i32
    %c0_i32_1 = arith.constant 0 : i32
    return %c0_i32, %c0_i32_0 : i32, i32
  }
  func.func @transform_3(%arg0: i32, %arg1: i32) -> (i32, i32, i32, i32) {
    %c0_i32 = arith.constant 0 : i32
    %c0_i32_0 = arith.constant 0 : i32
    %c0_i32_1 = arith.constant 0 : i32
    return %arg0, %arg1, %c0_i32, %c0_i32_0 : i32, i32, i32, i32
  }
}

</mosaic_0001>

<bundles_post_ra>
// kernel: tpu_custom_call.1
= control target key start
LH: loop header
LB: loop body
LE: loop exit
PB: predicated region body
PF: predicated region fallthrough
CT: control target
= control target key end

     0   :  { %8 = vsyncpa [#allocation4], 0  ;;  %s7439_s0 = inlined_call_operand.vmem [shape: f32[2,18,18,4], index: 0, kind: input, shape index: {}]   ;;  %s7440_s1 = inlined_call_operand.vmem [shape: f32[3,3,4,128], index: 1, kind: input, shape index: {}]   ;;  %s7441_s2 = inlined_call_operand.vmem [shape: f32[1,128], index: 2, kind: input, shape index: {}]   ;;  %s7442_s3 = inlined_call_operand.hbm [shape: f32[2,16,16,128], index: 3, kind: output, shape index: {}]  }
   0x1   :  { %10 = vsyncpa [#allocation4 + $0x1], 0  ;;  %s5838_s12 = smov 0   ;;  %s5840_s13 = smov 0  }
   0x2   :  { %s5842_s14 = smov 0   ;;  %s5844_s15 = smov 0  }
   0x3   :  { %s5846_s16 = smov 0   ;;  %s5848_s17 = smov 0  }
   0x4 LB: > { %s4419_s18 = sadd.s32 4294967295, %s5813_s17   ;;  %s4420_s19 = sadd.s32 4294967294, %s5813_s17   ;;  %s5813_s17 = sphi %s5848_s17, %s16_s17   ;;  %s5809_s16 = sphi %s5846_s16, %s7716_s16   ;;  %s5805_s15 = sphi %s5844_s15, %s7715_s15   ;;  %s5801_s14 = sphi %s5842_s14, %s7714_s14   ;;  %s5797_s13 = sphi %s5840_s13, %s7713_s13   ;;  %s5793_s12 = sphi %s5838_s12, %s7712_s12  }
   0x5   : > { %s28_s20 = sadd.s32 1, %s5809_s16  ;;  %s105_s21 = sadd.s32 1, %s5801_s14 }
   0x6   : > { %p30_p0 = scmp.ge.s32.totalorder %s28_s20, 2  ;;  %p115_p1 = scmp.ne.s32.totalorder %s5801_s14, %s5797_s13 }
   0x7   : > { %p116_p2 = scmp.eq.s32.totalorder %s4419_s18, 1  ;;  %p121_p3 = scmp.ne.s32.totalorder %s5797_s13, %s5793_s12 }
   0x8   : > { %s7718_s20 = smov (%p30_p0, %s28_s20), 0  ;;  %p122_p5 = scmp.eq.s32.totalorder %s4420_s19, 1 }
   0x9   : > { %p5878_p4 = por %p116_p2, %p115_p1  ;;  %s100_s23 = ssub.s32 %s5809_s16, %s7718_s20 }
   0xa   : > { %p4423_p6 = scmp.ge.s32.totalorder %s5813_s17, 1  ;;  %p103_p7 = scmp.eq.s32.totalorder %s100_s23, 0 }
   0xb   : > { %p5885_p8 = por %p122_p5, %p121_p3  ;;  %p154_p9 = scmp.lt.s32.totalorder %s5813_s17, 3 }
   0xc   : > { %s5891_s25 = scalar_select %p103_p7, %s5801_s14, %s105_s21  }
   0xd   : > { %p155_p10 = pnand %p4423_p6, %p154_p9 }
   0xf   : > { %158 = sbr.rel (%p155_p10) target bundleno = 529 (0x211), region = 32 }
  0x14   : > { %v219_v0 = vld [vmem:[%s7440_s1] sm:$0xf]  ;;  %vm317_vm0 = vcmask 1043456   ;;  %p178_p11 = scmp.lt.s32.totalorder %s5805_s15, 1  ;;  %v4459_v1 = vld [vmem:[%s7440_s1 + $0x4] sm:$0xf] }
  0x15   : > { %5677 = vmatprep.subr.msk.mxu1 %vm317_vm0, %v219_v0  ;;  %5227 = vmatprep.subr.msk.mxu0 %vm317_vm0, %v219_v0  ;;  %v4493_v2 = vld [vmem:[%s7440_s1 + $0x8] sm:$0xf]  ;;  %vm220_vm1 = vcmask 31744   ;;  %v5938_v9 = vld [vmem:[%s7440_s1 + $0xc] sm:$0xf]  ;;  %s4929_s10 = sshll.u32 %s5805_s15, 12 }
  0x16   : > { %5678 = vmatpush3.msk.msra.mxu1 %vm317_vm0, %v219_v0  ;;  %5228 = vmatpush3.msk.msra.mxu0 %vm317_vm0, %v219_v0  ;;  %s179_s5 = scalar_select %p178_p11, %s5805_s15, 1  ;;  %v5943_v10 = vld [vmem:[%s7440_s1 + $0x10] sm:$0xf]  ;;  %v6102_v43 = vld [vmem:[%s7440_s1 + $0x14] sm:$0xf] }
  0x17   : > { %5277 = vmatprep.subr.msk.mxu1 %vm317_vm0, %v4459_v1  ;;  %5327 = vmatprep.subr.msk.mxu0 %vm317_vm0, %v4493_v2  ;;  %v6107_v44 = vld [vmem:[%s7440_s1 + $0x18] sm:$0xf]  ;;  %s7385_s21 = scalar_lea.hbm %s7442_s3, %s4929_s10  ;;  %s5815_s26 = smov [#allocation3]  }
  0x18   : > { %s5679_s6 = smul.u32 432, %s179_s5  ;;  %s175_s5 = sand.u32 1, %s5797_s13  }
  0x19   : > { %s7394_s15 = scalar_lea.sflag [#allocation4], %s175_s5  ;;  %s5741_s27 = sshll.u32 %s5815_s26, 4  ;;  %s5742_s27 = int_to_ptr.vmem [resolvable:$false] %s5741_s27 }
  0x1a   : > { %s5913_s9 = scalar_lea.vmem %s7439_s0, %s5679_s6  ;;  %s4424_s6 = sshll.u32 %s175_s5, 8 }
  0x1b   : > { %v187_v3 = vld [vmem:[%s5913_s9] sm:$0xff]  ;;  %v188_v5 = vld [vmem:[%s5913_s9 + $0x8] sm:$0xff]  ;;  %v5927_v7 = vld [vmem:[%s5913_s9 + $0x18] sm:$0xff]  ;;  %s5743_s28 = scalar_lea.vmem %s5742_s27, 8192 }
  0x1c   : > { %v5917_v4 = vld [vmem:[%s5913_s9 + $0xc0] sm:$0xff]  ;;  %5229 = vmatprep.mubr.msk.f32.mxu0 %vm220_vm1, %v187_v3  ;;  %v5924_v6 = vld [vmem:[%s5913_s9 + $0xc8] sm:$0xff]  ;;  %v5930_v8 = vld [vmem:[%s5913_s9 + $0xd8] sm:$0xff] }
  0x1d   : > { %5253 = vmatprep.mubr.msk.f32.mxu1 %vm220_vm1, %v5917_v4  ;;  %5230 = vmatmul.mubr.msk.f32.vlgmr.msra.gmra.mxu0 %vm220_vm1, %v188_v5  ;;  %v5948_v11 = vld [vmem:[%s5913_s9 + $0x20] sm:$0xff]  ;;  %v5958_v13 = vld [vmem:[%s5913_s9 + $0x30] sm:$0xff]  ;;  %v5976_v15 = vld [vmem:[%s5913_s9 + $0x38] sm:$0xff] }
  0x1e   : > { %5254 = vmatmul.mubr.msk.f32.vlgmr.msra.gmra.mxu1 %vm220_vm1, %v5924_v6  ;;  %5328 = vmatpush3.msk.msra.mxu0 %vm317_vm0, %v4493_v2  ;;  %v5951_v12 = vld [vmem:[%s5913_s9 + $0xe0] sm:$0xff]  ;;  %v5961_v14 = vld [vmem:[%s5913_s9 + $0xf0] sm:$0xff]  ;;  %v5979_v16 = vld [vmem:[%s5913_s9 + $0xf8] sm:$0xff] }
  0x1f   : > { %5278 = vmatpush3.msk.msra.mxu1 %vm317_vm0, %v4459_v1  ;;  %5232 = vmatprep.mubr.msk.f32.mxu0 %vm220_vm1, %v5927_v7  ;;  %v5982_v17 = vld [vmem:[%s5913_s9 + $0x48] sm:$0xff]  ;;  %v5996_v19 = vld [vmem:[%s5913_s9 + $0x50] sm:$0xff]  ;;  %v6002_v21 = vld [vmem:[%s5913_s9 + $0x60] sm:$0xff] }
  0x20   : > { %5256 = vmatprep.mubr.msk.f32.mxu1 %vm220_vm1, %v5930_v8  ;;  %5377 = vmatprep.subr.msk.mxu1 %vm317_vm0, %v5938_v9  ;;  %v5985_v18 = vld [vmem:[%s5913_s9 + $0x108] sm:$0xff]  ;;  %v5999_v20 = vld [vmem:[%s5913_s9 + $0x110] sm:$0xff]  ;;  %v6005_v22 = vld [vmem:[%s5913_s9 + $0x120] sm:$0xff] }
  0x21   : > { %5427 = vmatprep.subr.msk.mxu0 %vm317_vm0, %v5943_v10  ;;  %5233 = vmatmul.mubr.msk.f32.gmra.mxu0 %vm220_vm1, %v5948_v11  ;;  %v6016_v23 = vld [vmem:[%s5913_s9 + $0x68] sm:$0xff]  ;;  %v6022_v25 = vld [vmem:[%s5913_s9 + $0x78] sm:$0xff]  ;;  %v6036_v27 = vld [vmem:[%s5913_s9 + $0x80] sm:$0xff] }
  0x22   : > { %5257 = vmatmul.mubr.msk.f32.gmra.mxu1 %vm220_vm1, %v5951_v12  ;;  %5235 = vmatprep.mubr.msk.f32.mxu0 %vm220_vm1, %v5958_v13  ;;  %v6019_v24 = vld [vmem:[%s5913_s9 + $0x128] sm:$0xff]  ;;  %v6025_v26 = vld [vmem:[%s5913_s9 + $0x138] sm:$0xff]  ;;  %v6039_v28 = vld [vmem:[%s5913_s9 + $0x140] sm:$0xff] }
  0x23   : > { %5259 = vmatprep.mubr.msk.f32.mxu1 %vm220_vm1, %v5961_v14  ;;  %v6042_v29 = vld [vmem:[%s5913_s9 + $0x90] sm:$0xff]  ;;  %v6056_v31 = vld [vmem:[%s5913_s9 + $0x98] sm:$0xff]  ;;  %v6062_v33 = vld [vmem:[%s5913_s9 + $0xa8] sm:$0xff] }
  0x24   : > { %v6045_v30 = vld [vmem:[%s5913_s9 + $0x150] sm:$0xff]  ;;  %v6059_v32 = vld [vmem:[%s5913_s9 + $0x158] sm:$0xff]  ;;  %v6065_v34 = vld [vmem:[%s5913_s9 + $0x168] sm:$0xff] }
  0x25   : > { %5236 = vmatmul.mubr.msk.f32.gmra.mxu0 %vm220_vm1, %v5976_v15  ;;  %v6076_v35 = vld [vmem:[%s5913_s9 + $0xb0] sm:$0xff]  ;;  %v578_v37 = vld [vmem:[%s5913_s9 + $0x1] sm:$0xff]  ;;  %v6092_v41 = vld [vmem:[%s5913_s9 + $0x19] sm:$0xff] }
  0x26   : > { %5260 = vmatmul.mubr.msk.f32.gmra.mxu1 %vm220_vm1, %v5979_v16  ;;  %5238 = vmatprep.mubr.msk.f32.mxu0 %vm220_vm1, %v5982_v17  ;;  %v6079_v36 = vld [vmem:[%s5913_s9 + $0x170] sm:$0xff]  ;;  %v1032_v38 = vld [vmem:[%s5913_s9 + $0x2] sm:$0xff]  ;;  %v6095_v42 = vld [vmem:[%s5913_s9 + $0x1a] sm:$0xff] }
  0x27   : > { %5262 = vmatprep.mubr.msk.f32.mxu1 %vm220_vm1, %v5985_v18  ;;  %7512 = vst [vmem:[#allocation6_spill] sm:$0xff] %v6079_v36  ;;  %v579_v39 = vld [vmem:[%s5913_s9 + $0x9] sm:$0xff]  ;;  %7513 = vst [vmem:[#allocation7_spill] sm:$0xff] %v6095_v42  ;;  %v6114_v45 = vld [vmem:[%s5913_s9 + $0x21] sm:$0xff] }
  0x28   : > { %v1033_v40 = vld [vmem:[%s5913_s9 + $0xa] sm:$0xff]  ;;  %v6117_v46 = vld [vmem:[%s5913_s9 + $0x22] sm:$0xff]  ;;  %v6127_v48 = vld [vmem:[%s5913_s9 + $0x32] sm:$0xff] }
  0x29   : > { %5239 = vmatmul.mubr.msk.f32.gmra.mxu0 %vm220_vm1, %v5996_v19  ;;  %7514 = vst [vmem:[#allocation8_spill] sm:$0xff] %v6117_v46  ;;  %v6124_v47 = vld [vmem:[%s5913_s9 + $0x31] sm:$0xff]  ;;  %7515 = vst [vmem:[#allocation9_spill] sm:$0xff] %v6127_v48  ;;  %v6142_v49 = vld [vmem:[%s5913_s9 + $0x39] sm:$0xff] }
  0x2a   : > { %5263 = vmatmul.mubr.msk.f32.gmra.mxu1 %vm220_vm1, %v5999_v20  ;;  %5241 = vmatprep.mubr.msk.f32.mxu0 %vm220_vm1, %v6002_v21  ;;  %v6145_v50 = vld [vmem:[%s5913_s9 + $0x3a] sm:$0xff]  ;;  %v6148_v51 = vld [vmem:[%s5913_s9 + $0x49] sm:$0xff]  ;;  %v6162_v53 = vld [vmem:[%s5913_s9 + $0x51] sm:$0xff] }
  0x2b   : > { %5265 = vmatprep.mubr.msk.f32.mxu1 %vm220_vm1, %v6005_v22  ;;  %7516 = vst [vmem:[#allocation10_spill] sm:$0xff] %v6145_v50  ;;  %v6151_v52 = vld [vmem:[%s5913_s9 + $0x4a] sm:$0xff]  ;;  %v6165_v54 = vld [vmem:[%s5913_s9 + $0x52] sm:$0xff]  ;;  %v6168_v55 = vld [vmem:[%s5913_s9 + $0x61] sm:$0xff] }
  0x2c   : > { %7517 = vst [vmem:[#allocation11_spill] sm:$0xff] %v6151_v52  ;;  %7518 = vst [vmem:[#allocation12_spill] sm:$0xff] %v6165_v54  ;;  %v6171_v56 = vld [vmem:[%s5913_s9 + $0x62] sm:$0xff]  ;;  %v6185_v58 = vld [vmem:[%s5913_s9 + $0x6a] sm:$0xff] }
  0x2d   : > { %5242 = vmatmul.mubr.msk.f32.gmra.mxu0 %vm220_vm1, %v6016_v23  ;;  %7519 = vst [vmem:[#allocation13_spill] sm:$0xff] %v6171_v56  ;;  %v6182_v57 = vld [vmem:[%s5913_s9 + $0x69] sm:$0xff]  ;;  %7520 = vst [vmem:[#allocation14_spill] sm:$0xff] %v6185_v58  ;;  %v6188_v59 = vld [vmem:[%s5913_s9 + $0x79] sm:$0xff] }
  0x2e   : > { %5266 = vmatmul.mubr.msk.f32.gmra.mxu1 %vm220_vm1, %v6019_v24  ;;  %5244 = vmatprep.mubr.msk.f32.mxu0 %vm220_vm1, %v6022_v25  ;;  %v6191_v60 = vld [vmem:[%s5913_s9 + $0x7a] sm:$0xff]  ;;  %v6205_v62 = vld [vmem:[%s5913_s9 + $0x82] sm:$0xff]  ;;  %v6208_v63 = vld [vmem:[%s5913_s9 + $0x91] sm:$0xff] }
  0x2f   : > { %5268 = vmatprep.mubr.msk.f32.mxu1 %vm220_vm1, %v6025_v26  ;;  %7521 = vst [vmem:[#allocation15_spill] sm:$0xff] %v6191_v60  ;;  %v6202_v61 = vld [vmem:[%s5913_s9 + $0x81] sm:$0xff]  ;;  %7522 = vst [vmem:[#allocation16_spill] sm:$0xff] %v6205_v62  ;;  %v6211_v0 = vld [vmem:[%s5913_s9 + $0x92] sm:$0xff] }
  0x30   : > { %7523 = vst [vmem:[#allocation17_spill] sm:$0xff] %v6211_v0  ;;  %v6222_v1 = vld [vmem:[%s5913_s9 + $0x99] sm:$0xff]  ;;  %v6228_v3 = vld [vmem:[%s5913_s9 + $0xa9] sm:$0xff] }
  0x31   : > { %5245 = vmatmul.mubr.msk.f32.gmra.mxu0 %vm220_vm1, %v6036_v27  ;;  %v6225_v2 = vld [vmem:[%s5913_s9 + $0x9a] sm:$0xff]  ;;  %v6231_v5 = vld [vmem:[%s5913_s9 + $0xaa] sm:$0xff] }
  0x32   : > { %5269 = vmatmul.mubr.msk.f32.gmra.mxu1 %vm220_vm1, %v6039_v28  ;;  %5247 = vmatprep.mubr.msk.f32.mxu0 %vm220_vm1, %v6042_v29  ;;  %7524 = vst [vmem:[#allocation18_spill] sm:$0xff] %v6225_v2  ;;  %7525 = vst [vmem:[#allocation19_spill] sm:$0xff] %v6231_v5 }
  0x33   : > { %5271 = vmatprep.mubr.msk.f32.mxu1 %vm220_vm1, %v6045_v30 }
  0x35   : > { %5248 = vmatmul.mubr.msk.f32.gmra.mxu0 %vm220_vm1, %v6056_v31 }
  0x36   : > { %5272 = vmatmul.mubr.msk.f32.gmra.mxu1 %vm220_vm1, %v6059_v32  ;;  %5250 = vmatprep.mubr.msk.f32.mxu0 %vm220_vm1, %v6062_v33 }
  0x37   : > { %5274 = vmatprep.mubr.msk.f32.mxu1 %vm220_vm1, %v6065_v34 }
  0x39   : > { %5251 = vmatmul.mubr.msk.f32.gmra.mxu0 %vm220_vm1, %v6076_v35 }
  0x3a   : > { %5275 = vmatmul.mubr.msk.f32.gmra.mxu1 %vm220_vm1, %v6079_v36  ;;  %5329 = vmatprep.mubr.msk.f32.mxu0 %vm220_vm1, %v1032_v38  ;;  %v6251_v38 = vld [vmem:[%s5913_s9 + $0xc2] sm:$0xff]  ;;  %v6391_v36 = vld [vmem:[%s5913_s9 + $0x16a] sm:$0xff] }
  0x3b   : > { %5279 = vmatprep.mubr.msk.f32.mxu1 %vm220_vm1, %v578_v37  ;;  %v6248_v37 = vld [vmem:[%s5913_s9 + $0xc1] sm:$0xff]  ;;  %7527 = vst [vmem:[#allocation21_spill] sm:$0xff] %v6251_v38  ;;  %7547 = vst [vmem:[#allocation41_spill] sm:$0xff] %v6391_v36 }
  0x3d   : > { %5330 = vmatmul.mubr.msk.f32.vlgmr.msra.gmra.mxu0 %vm220_vm1, %v1033_v40  ;;  %v6265_v40 = vld [vmem:[%s5913_s9 + $0xca] sm:$0xff] }
  0x3e   : > { %5280 = vmatmul.mubr.msk.f32.vlgmr.msra.gmra.mxu1 %vm220_vm1, %v579_v39  ;;  %5428 = vmatpush3.msk.msra.mxu0 %vm317_vm0, %v5943_v10  ;;  %v6245_v10 = vld [vmem:[%s5913_s9 + $0xb2] sm:$0xff]  ;;  %v6262_v39 = vld [vmem:[%s5913_s9 + $0xc9] sm:$0xff]  ;;  %7528 = vst [vmem:[#allocation22_spill] sm:$0xff] %v6265_v40 }
  0x3f   : > { %5378 = vmatpush3.msk.msra.mxu1 %vm317_vm0, %v5938_v9  ;;  %5282 = vmatprep.mubr.msk.f32.mxu1 %vm220_vm1, %v6092_v41  ;;  %v6242_v9 = vld [vmem:[%s5913_s9 + $0xb1] sm:$0xff]  ;;  %7526 = vst [vmem:[#allocation20_spill] sm:$0xff] %v6245_v10 }
  0x40   : > { %5332 = vmatprep.mubr.msk.f32.mxu0 %vm220_vm1, %v6095_v42  ;;  %5477 = vmatprep.subr.msk.mxu1 %vm317_vm0, %v6102_v43  ;;  %v6388_v42 = vld [vmem:[%s5913_s9 + $0x169] sm:$0xff] }
  0x41   : > { %5527 = vmatprep.subr.msk.mxu0 %vm317_vm0, %v6107_v44  ;;  %5333 = vmatmul.mubr.msk.f32.gmra.mxu0 %vm220_vm1, %v6117_v46  ;;  %v6371_v46 = vld [vmem:[%s5913_s9 + $0x152] sm:$0xff] }
  0x42   : > { %5283 = vmatmul.mubr.msk.f32.gmra.mxu1 %vm220_vm1, %v6114_v45  ;;  %5335 = vmatprep.mubr.msk.f32.mxu0 %vm220_vm1, %v6127_v48  ;;  %v6368_v48 = vld [vmem:[%s5913_s9 + $0x151] sm:$0xff]  ;;  %7544 = vst [vmem:[#allocation38_spill] sm:$0xff] %v6371_v46 }
  0x43   : > { %5285 = vmatprep.mubr.msk.f32.mxu1 %vm220_vm1, %v6124_v47  ;;  %7543 = vst [vmem:[#allocation37_spill] sm:$0xff] %v6368_v48 }
  0x45   : > { %5336 = vmatmul.mubr.msk.f32.gmra.mxu0 %vm220_vm1, %v6145_v50  ;;  %v6351_v50 = vld [vmem:[%s5913_s9 + $0x13a] sm:$0xff] }
  0x46   : > { %5286 = vmatmul.mubr.msk.f32.gmra.mxu1 %vm220_vm1, %v6142_v49  ;;  %5338 = vmatprep.mubr.msk.f32.mxu0 %vm220_vm1, %v6151_v52  ;;  %v6348_v52 = vld [vmem:[%s5913_s9 + $0x139] sm:$0xff]  ;;  %7540 = vst [vmem:[#allocation34_spill] sm:$0xff] %v6351_v50 }
  0x47   : > { %5288 = vmatprep.mubr.msk.f32.mxu1 %vm220_vm1, %v6148_v51  ;;  %7539 = vst [vmem:[#allocation33_spill] sm:$0xff] %v6348_v52 }
  0x49   : > { %5339 = vmatmul.mubr.msk.f32.gmra.mxu0 %vm220_vm1, %v6165_v54  ;;  %v6331_v54 = vld [vmem:[%s5913_s9 + $0x122] sm:$0xff] }
  0x4a   : > { %5289 = vmatmul.mubr.msk.f32.gmra.mxu1 %vm220_vm1, %v6162_v53  ;;  %5341 = vmatprep.mubr.msk.f32.mxu0 %vm220_vm1, %v6171_v56  ;;  %v6328_v56 = vld [vmem:[%s5913_s9 + $0x121] sm:$0xff]  ;;  %7536 = vst [vmem:[#allocation30_spill] sm:$0xff] %v6331_v54 }
  0x4b   : > { %5291 = vmatprep.mubr.msk.f32.mxu1 %vm220_vm1, %v6168_v55  ;;  %7535 = vst [vmem:[#allocation29_spill] sm:$0xff] %v6328_v56 }
  0x4d   : > { %5342 = vmatmul.mubr.msk.f32.gmra.mxu0 %vm220_vm1, %v6185_v58  ;;  %v6311_v58 = vld [vmem:[%s5913_s9 + $0x10a] sm:$0xff] }
  0x4e   : > { %5292 = vmatmul.mubr.msk.f32.gmra.mxu1 %vm220_vm1, %v6182_v57  ;;  %5344 = vmatprep.mubr.msk.f32.mxu0 %vm220_vm1, %v6191_v60  ;;  %v6308_v60 = vld [vmem:[%s5913_s9 + $0x109] sm:$0xff]  ;;  %7533 = vst [vmem:[#allocation27_spill] sm:$0xff] %v6311_v58 }
  0x4f   : > { %5294 = vmatprep.mubr.msk.f32.mxu1 %vm220_vm1, %v6188_v59 }
  0x51   : > { %5345 = vmatmul.mubr.msk.f32.gmra.mxu0 %vm220_vm1, %v6205_v62  ;;  %v6291_v62 = vld [vmem:[%s5913_s9 + $0xf2] sm:$0xff] }
  0x52   : > { %5295 = vmatmul.mubr.msk.f32.gmra.mxu1 %vm220_vm1, %v6202_v61  ;;  %5347 = vmatprep.mubr.msk.f32.mxu0 %vm220_vm1, %v6211_v0  ;;  %v6288_v0 = vld [vmem:[%s5913_s9 + $0xf1] sm:$0xff]  ;;  %7531 = vst [vmem:[#allocation25_spill] sm:$0xff] %v6291_v62 }
  0x53   : > { %5297 = vmatprep.mubr.msk.f32.mxu1 %vm220_vm1, %v6208_v63 }
  0x55   : > { %5348 = vmatmul.mubr.msk.f32.gmra.mxu0 %vm220_vm1, %v6225_v2  ;;  %v6271_v2 = vld [vmem:[%s5913_s9 + $0xda] sm:$0xff] }
  0x56   : > { %5298 = vmatmul.mubr.msk.f32.gmra.mxu1 %vm220_vm1, %v6222_v1  ;;  %5350 = vmatprep.mubr.msk.f32.mxu0 %vm220_vm1, %v6231_v5  ;;  %v6268_v5 = vld [vmem:[%s5913_s9 + $0xd9] sm:$0xff]  ;;  %7529 = vst [vmem:[#allocation23_spill] sm:$0xff] %v6271_v2 }
  0x57   : > { %5300 = vmatprep.mubr.msk.f32.mxu1 %vm220_vm1, %v6228_v3 }
  0x59   : > { %5351 = vmatmul.mubr.msk.f32.gmra.mxu0 %vm220_vm1, %v6245_v10  ;;  %v6285_v10 = vld [vmem:[%s5913_s9 + $0xe2] sm:$0xff] }
  0x5a   : > { %5301 = vmatmul.mubr.msk.f32.gmra.mxu1 %vm220_vm1, %v6242_v9  ;;  %5353 = vmatprep.mubr.msk.f32.mxu0 %vm220_vm1, %v6251_v38  ;;  %v6282_v38 = vld [vmem:[%s5913_s9 + $0xe1] sm:$0xff]  ;;  %7530 = vst [vmem:[#allocation24_spill] sm:$0xff] %v6285_v10 }
  0x5b   : > { %5303 = vmatprep.mubr.msk.f32.mxu1 %vm220_vm1, %v6248_v37 }
  0x5d   : > { %5354 = vmatmul.mubr.msk.f32.gmra.mxu0 %vm220_vm1, %v6265_v40  ;;  %v6305_v40 = vld [vmem:[%s5913_s9 + $0xfa] sm:$0xff] }
  0x5e   : > { %5304 = vmatmul.mubr.msk.f32.gmra.mxu1 %vm220_vm1, %v6262_v39  ;;  %5356 = vmatprep.mubr.msk.f32.mxu0 %vm220_vm1, %v6271_v2  ;;  %v6302_v2 = vld [vmem:[%s5913_s9 + $0xf9] sm:$0xff]  ;;  %7532 = vst [vmem:[#allocation26_spill] sm:$0xff] %v6305_v40 }
  0x5f   : > { %5306 = vmatprep.mubr.msk.f32.mxu1 %vm220_vm1, %v6268_v5 }
  0x61   : > { %5357 = vmatmul.mubr.msk.f32.gmra.mxu0 %vm220_vm1, %v6285_v10  ;;  %v6325_v10 = vld [vmem:[%s5913_s9 + $0x112] sm:$0xff] }
  0x62   : > { %5307 = vmatmul.mubr.msk.f32.gmra.mxu1 %vm220_vm1, %v6282_v38  ;;  %5359 = vmatprep.mubr.msk.f32.mxu0 %vm220_vm1, %v6291_v62  ;;  %v6322_v62 = vld [vmem:[%s5913_s9 + $0x111] sm:$0xff]  ;;  %7534 = vst [vmem:[#allocation28_spill] sm:$0xff] %v6325_v10 }
  0x63   : > { %5309 = vmatprep.mubr.msk.f32.mxu1 %vm220_vm1, %v6288_v0 }
  0x65   : > { %5360 = vmatmul.mubr.msk.f32.gmra.mxu0 %vm220_vm1, %v6305_v40  ;;  %v6345_v40 = vld [vmem:[%s5913_s9 + $0x12a] sm:$0xff] }
  0x66   : > { %5310 = vmatmul.mubr.msk.f32.gmra.mxu1 %vm220_vm1, %v6302_v2  ;;  %5362 = vmatprep.mubr.msk.f32.mxu0 %vm220_vm1, %v6311_v58  ;;  %v6342_v58 = vld [vmem:[%s5913_s9 + $0x129] sm:$0xff]  ;;  %7538 = vst [vmem:[#allocation32_spill] sm:$0xff] %v6345_v40 }
  0x67   : > { %5312 = vmatprep.mubr.msk.f32.mxu1 %vm220_vm1, %v6308_v60  ;;  %7537 = vst [vmem:[#allocation31_spill] sm:$0xff] %v6342_v58 }
  0x69   : > { %5363 = vmatmul.mubr.msk.f32.gmra.mxu0 %vm220_vm1, %v6325_v10  ;;  %v6365_v10 = vld [vmem:[%s5913_s9 + $0x142] sm:$0xff] }
  0x6a   : > { %5313 = vmatmul.mubr.msk.f32.gmra.mxu1 %vm220_vm1, %v6322_v62  ;;  %5365 = vmatprep.mubr.msk.f32.mxu0 %vm220_vm1, %v6331_v54  ;;  %v6362_v54 = vld [vmem:[%s5913_s9 + $0x141] sm:$0xff]  ;;  %7542 = vst [vmem:[#allocation36_spill] sm:$0xff] %v6365_v10 }
  0x6b   : > { %5315 = vmatprep.mubr.msk.f32.mxu1 %vm220_vm1, %v6328_v56  ;;  %7541 = vst [vmem:[#allocation35_spill] sm:$0xff] %v6362_v54 }
  0x6d   : > { %5366 = vmatmul.mubr.msk.f32.gmra.mxu0 %vm220_vm1, %v6345_v40  ;;  %v6385_v40 = vld [vmem:[%s5913_s9 + $0x15a] sm:$0xff] }
  0x6e   : > { %5316 = vmatmul.mubr.msk.f32.gmra.mxu1 %vm220_vm1, %v6342_v58  ;;  %5368 = vmatprep.mubr.msk.f32.mxu0 %vm220_vm1, %v6351_v50  ;;  %v6382_v50 = vld [vmem:[%s5913_s9 + $0x159] sm:$0xff]  ;;  %7546 = vst [vmem:[#allocation40_spill] sm:$0xff] %v6385_v40 }
  0x6f   : > { %5318 = vmatprep.mubr.msk.f32.mxu1 %vm220_vm1, %v6348_v52  ;;  %7545 = vst [vmem:[#allocation39_spill] sm:$0xff] %v6382_v50 }
  0x71   : > { %5369 = vmatmul.mubr.msk.f32.gmra.mxu0 %vm220_vm1, %v6365_v10  ;;  %v6405_v10 = vld [vmem:[%s5913_s9 + $0x172] sm:$0xff] }
  0x72   : > { %5319 = vmatmul.mubr.msk.f32.gmra.mxu1 %vm220_vm1, %v6362_v54  ;;  %5371 = vmatprep.mubr.msk.f32.mxu0 %vm220_vm1, %v6371_v46  ;;  %v6402_v46 = vld [vmem:[%s5913_s9 + $0x171] sm:$0xff]  ;;  %7548 = vst [vmem:[#allocation42_spill] sm:$0xff] %v6405_v10 }
  0x73   : > { %5321 = vmatprep.mubr.msk.f32.mxu1 %vm220_vm1, %v6368_v48 }
  0x75   : > { %5372 = vmatmul.mubr.msk.f32.gmra.mxu0 %vm220_vm1, %v6385_v40 }
  0x76   : > { %5322 = vmatmul.mubr.msk.f32.gmra.mxu1 %vm220_vm1, %v6382_v50  ;;  %5374 = vmatprep.mubr.msk.f32.mxu0 %vm220_vm1, %v6391_v36  ;;  %v6422_v36 = vld [vmem:[%s7440_s1 + $0x1c] sm:$0xf] }
  0x77   : > { %5324 = vmatprep.mubr.msk.f32.mxu1 %vm220_vm1, %v6388_v42 }
  0x79   : > { %5375 = vmatmul.mubr.msk.f32.gmra.mxu0 %vm220_vm1, %v6405_v10  ;;  %v6427_v10 = vld [vmem:[%s7440_s1 + $0x20] sm:$0xf] }
  0x7a   : > { %5325 = vmatmul.mubr.msk.f32.gmra.mxu1 %vm220_vm1, %v6402_v46  ;;  %5429 = vmatprep.mubr.msk.f32.mxu0 %vm220_vm1, %v6092_v41  ;;  %v7550_v41 = vld [vmem:[#allocation6_spill] sm:$0xff] }
  0x7b   : > { %5379 = vmatprep.mubr.msk.f32.mxu1 %vm220_vm1, %v5927_v7  ;;  %v6546_v7 = vld [vmem:[%s5913_s9 + $0x180] sm:$0xff] }
  0x7d   : > { %5430 = vmatmul.mubr.msk.f32.vlgmr.msra.gmra.mxu0 %vm220_vm1, %v6114_v45  ;;  %v7553_v45 = vld [vmem:[#allocation8_spill] sm:$0xff] }
  0x7e   : > { %5380 = vmatmul.mubr.msk.f32.vlgmr.msra.gmra.mxu1 %vm220_vm1, %v5948_v11  ;;  %5528 = vmatpush3.msk.msra.mxu0 %vm317_vm0, %v6107_v44  ;;  %v6549_v11 = vld [vmem:[%s5913_s9 + $0x181] sm:$0xff]  ;;  %v6563_v44 = vld [vmem:[%s5913_s9 + $0x189] sm:$0xff] }
  0x7f   : > { %5478 = vmatpush3.msk.msra.mxu1 %vm317_vm0, %v6102_v43  ;;  %5382 = vmatprep.mubr.msk.f32.mxu1 %vm220_vm1, %v5958_v13  ;;  %7549 = vst [vmem:[#allocation43_spill] sm:$0xff] %v6549_v11  ;;  %v6560_v43 = vld [vmem:[%s5913_s9 + $0x188] sm:$0xff]  ;;  %7551 = vst [vmem:[#allocation6_spill] sm:$0xff] %v6563_v44 }
  0x80   : > { %5432 = vmatprep.mubr.msk.f32.mxu0 %vm220_vm1, %v6124_v47  ;;  %5577 = vmatprep.subr.msk.mxu1 %vm317_vm0, %v6422_v36 }
  0x81   : > { %5627 = vmatprep.subr.msk.mxu0 %vm317_vm0, %v6427_v10  ;;  %5433 = vmatmul.mubr.msk.f32.gmra.mxu0 %vm220_vm1, %v6142_v49 }
  0x82   : > { %5383 = vmatmul.mubr.msk.f32.gmra.mxu1 %vm220_vm1, %v5976_v15  ;;  %5435 = vmatprep.mubr.msk.f32.mxu0 %vm220_vm1, %v6148_v51 }
  0x83   : > { %5385 = vmatprep.mubr.msk.f32.mxu1 %vm220_vm1, %v5982_v17 }
  0x85   : > { %5436 = vmatmul.mubr.msk.f32.gmra.mxu0 %vm220_vm1, %v6162_v53 }
  0x86   : > { %5386 = vmatmul.mubr.msk.f32.gmra.mxu1 %vm220_vm1, %v5996_v19  ;;  %5438 = vmatprep.mubr.msk.f32.mxu0 %vm220_vm1, %v6168_v55 }
  0x87   : > { %5388 = vmatprep.mubr.msk.f32.mxu1 %vm220_vm1, %v6002_v21 }
  0x89   : > { %5439 = vmatmul.mubr.msk.f32.gmra.mxu0 %vm220_vm1, %v6182_v57 }
  0x8a   : > { %5389 = vmatmul.mubr.msk.f32.gmra.mxu1 %vm220_vm1, %v6016_v23  ;;  %5441 = vmatprep.mubr.msk.f32.mxu0 %vm220_vm1, %v6188_v59 }
  0x8b   : > { %5391 = vmatprep.mubr.msk.f32.mxu1 %vm220_vm1, %v6022_v25 }
  0x8d   : > { %5442 = vmatmul.mubr.msk.f32.gmra.mxu0 %vm220_vm1, %v6202_v61 }
  0x8e   : > { %5392 = vmatmul.mubr.msk.f32.gmra.mxu1 %vm220_vm1, %v6036_v27  ;;  %5444 = vmatprep.mubr.msk.f32.mxu0 %vm220_vm1, %v6208_v63 }
  0x8f   : > { %5394 = vmatprep.mubr.msk.f32.mxu1 %vm220_vm1, %v6042_v29 }
  0x91   : > { %5445 = vmatmul.mubr.msk.f32.gmra.mxu0 %vm220_vm1, %v6222_v1 }
  0x92   : > { %5395 = vmatmul.mubr.msk.f32.gmra.mxu1 %vm220_vm1, %v6056_v31  ;;  %5447 = vmatprep.mubr.msk.f32.mxu0 %vm220_vm1, %v6228_v3 }
  0x93   : > { %5397 = vmatprep.mubr.msk.f32.mxu1 %vm220_vm1, %v6062_v33 }
  0x95   : > { %5448 = vmatmul.mubr.msk.f32.gmra.mxu0 %vm220_vm1, %v6242_v9 }
  0x96   : > { %5398 = vmatmul.mubr.msk.f32.gmra.mxu1 %vm220_vm1, %v6076_v35  ;;  %5450 = vmatprep.mubr.msk.f32.mxu0 %vm220_vm1, %v6248_v37 }
  0x97   : > { %5400 = vmatprep.mubr.msk.f32.mxu1 %vm220_vm1, %v5917_v4 }
  0x99   : > { %5451 = vmatmul.mubr.msk.f32.gmra.mxu0 %vm220_vm1, %v6262_v39 }
  0x9a   : > { %5401 = vmatmul.mubr.msk.f32.gmra.mxu1 %vm220_vm1, %v5924_v6  ;;  %5453 = vmatprep.mubr.msk.f32.mxu0 %vm220_vm1, %v6268_v5 }
  0x9b   : > { %5403 = vmatprep.mubr.msk.f32.mxu1 %vm220_vm1, %v5930_v8 }
  0x9d   : > { %5454 = vmatmul.mubr.msk.f32.gmra.mxu0 %vm220_vm1, %v6282_v38 }
  0x9e   : > { %5404 = vmatmul.mubr.msk.f32.gmra.mxu1 %vm220_vm1, %v5951_v12  ;;  %5456 = vmatprep.mubr.msk.f32.mxu0 %vm220_vm1, %v6288_v0 }
  0x9f   : > { %5406 = vmatprep.mubr.msk.f32.mxu1 %vm220_vm1, %v5961_v14 }
  0xa1   : > { %5457 = vmatmul.mubr.msk.f32.gmra.mxu0 %vm220_vm1, %v6302_v2 }
  0xa2   : > { %5407 = vmatmul.mubr.msk.f32.gmra.mxu1 %vm220_vm1, %v5979_v16  ;;  %5459 = vmatprep.mubr.msk.f32.mxu0 %vm220_vm1, %v6308_v60 }
  0xa3   : > { %5409 = vmatprep.mubr.msk.f32.mxu1 %vm220_vm1, %v5985_v18 }
  0xa5   : > { %5460 = vmatmul.mubr.msk.f32.gmra.mxu0 %vm220_vm1, %v6322_v62 }
  0xa6   : > { %5410 = vmatmul.mubr.msk.f32.gmra.mxu1 %vm220_vm1, %v5999_v20  ;;  %5462 = vmatprep.mubr.msk.f32.mxu0 %vm220_vm1, %v6328_v56 }
  0xa7   : > { %5412 = vmatprep.mubr.msk.f32.mxu1 %vm220_vm1, %v6005_v22 }
  0xa9   : > { %5463 = vmatmul.mubr.msk.f32.gmra.mxu0 %vm220_vm1, %v6342_v58 }
  0xaa   : > { %5413 = vmatmul.mubr.msk.f32.gmra.mxu1 %vm220_vm1, %v6019_v24  ;;  %5465 = vmatprep.mubr.msk.f32.mxu0 %vm220_vm1, %v6348_v52  ;;  %v7576_v52 = vld [vmem:[#allocation28_spill] sm:$0xff] }
  0xab   : > { %5415 = vmatprep.mubr.msk.f32.mxu1 %vm220_vm1, %v6025_v26 }
  0xad   : > { %5466 = vmatmul.mubr.msk.f32.gmra.mxu0 %vm220_vm1, %v6362_v54 }
  0xae   : > { %5416 = vmatmul.mubr.msk.f32.gmra.mxu1 %vm220_vm1, %v6039_v28  ;;  %5468 = vmatprep.mubr.msk.f32.mxu0 %vm220_vm1, %v6368_v48 }
  0xaf   : > { %5418 = vmatprep.mubr.msk.f32.mxu1 %vm220_vm1, %v6045_v30 }
  0xb1   : > { %5469 = vmatmul.mubr.msk.f32.gmra.mxu0 %vm220_vm1, %v6382_v50 }
  0xb2   : > { %5419 = vmatmul.mubr.msk.f32.gmra.mxu1 %vm220_vm1, %v6059_v32  ;;  %5471 = vmatprep.mubr.msk.f32.mxu0 %vm220_vm1, %v6388_v42  ;;  %v7552_v42 = vld [vmem:[#allocation7_spill] sm:$0xff] }
  0xb3   : > { %5421 = vmatprep.mubr.msk.f32.mxu1 %vm220_vm1, %v6065_v34 }
  0xb5   : > { %5472 = vmatmul.mubr.msk.f32.gmra.mxu0 %vm220_vm1, %v6402_v46  ;;  %v7554_v46 = vld [vmem:[#allocation9_spill] sm:$0xff] }
  0xb6   : > { %5422 = vmatmul.mubr.msk.f32.gmra.mxu1 %vm220_vm1, %v7550_v41  ;;  %5474 = vmatprep.mubr.msk.f32.mxu0 %vm220_vm1, %v6549_v11  ;;  %v7572_v11 = vld [vmem:[#allocation26_spill] sm:$0xff] }
  0xb7   : > { %5424 = vmatprep.mubr.msk.f32.mxu1 %vm220_vm1, %v6546_v7 }
  0xb9   : > { %5475 = vmatmul.mubr.msk.f32.gmra.mxu0 %vm220_vm1, %v6563_v44 }
  0xba   : > { %5425 = vmatmul.mubr.msk.f32.gmra.mxu1 %vm220_vm1, %v6560_v43  ;;  %5529 = vmatprep.mubr.msk.f32.mxu0 %vm220_vm1, %v5958_v13  ;;  %v7556_v13 = vld [vmem:[#allocation11_spill] sm:$0xff] }
  0xbb   : > { %5479 = vmatprep.mubr.msk.f32.mxu1 %vm220_vm1, %v7552_v42  ;;  %v7555_v42 = vld [vmem:[#allocation10_spill] sm:$0xff] }
  0xbd   : > { %5530 = vmatmul.mubr.msk.f32.vlgmr.msra.gmra.mxu0 %vm220_vm1, %v5976_v15  ;;  %v7557_v15 = vld [vmem:[#allocation12_spill] sm:$0xff] }
  0xbe   : > { %5480 = vmatmul.mubr.msk.f32.vlgmr.msra.gmra.mxu1 %vm220_vm1, %v7553_v45  ;;  %5628 = vmatpush3.msk.msra.mxu0 %vm317_vm0, %v6427_v10  ;;  %v7569_v10 = vld [vmem:[#allocation24_spill] sm:$0xff] }
  0xbf   : > { %5578 = vmatpush3.msk.msra.mxu1 %vm317_vm0, %v6422_v36  ;;  %5482 = vmatprep.mubr.msk.f32.mxu1 %vm220_vm1, %v7554_v46  ;;  %v7558_v36 = vld [vmem:[#allocation13_spill] sm:$0xff] }
  0xc0   : > { %5532 = vmatprep.mubr.msk.f32.mxu0 %vm220_vm1, %v5982_v17  ;;  %v7559_v17 = vld [vmem:[#allocation14_spill] sm:$0xff] }
  0xc1   : > { %5533 = vmatmul.mubr.msk.f32.gmra.mxu0 %vm220_vm1, %v5996_v19  ;;  %v7560_v19 = vld [vmem:[#allocation15_spill] sm:$0xff] }
  0xc2   : > { %5483 = vmatmul.mubr.msk.f32.gmra.mxu1 %vm220_vm1, %v7555_v42  ;;  %5535 = vmatprep.mubr.msk.f32.mxu0 %vm220_vm1, %v6002_v21  ;;  %v7561_v21 = vld [vmem:[#allocation16_spill] sm:$0xff] }
  0xc3   : > { %5485 = vmatprep.mubr.msk.f32.mxu1 %vm220_vm1, %v7556_v13 }
  0xc5   : > { %5536 = vmatmul.mubr.msk.f32.gmra.mxu0 %vm220_vm1, %v6016_v23  ;;  %v7562_v23 = vld [vmem:[#allocation17_spill] sm:$0xff] }
  0xc6   : > { %5486 = vmatmul.mubr.msk.f32.gmra.mxu1 %vm220_vm1, %v7557_v15  ;;  %5538 = vmatprep.mubr.msk.f32.mxu0 %vm220_vm1, %v6022_v25  ;;  %v7563_v25 = vld [vmem:[#allocation18_spill] sm:$0xff] }
  0xc7   : > { %5488 = vmatprep.mubr.msk.f32.mxu1 %vm220_vm1, %v7558_v36 }
  0xc9   : > { %5539 = vmatmul.mubr.msk.f32.gmra.mxu0 %vm220_vm1, %v6036_v27  ;;  %v7564_v27 = vld [vmem:[#allocation19_spill] sm:$0xff] }
  0xca   : > { %5489 = vmatmul.mubr.msk.f32.gmra.mxu1 %vm220_vm1, %v7559_v17  ;;  %5541 = vmatprep.mubr.msk.f32.mxu0 %vm220_vm1, %v6042_v29  ;;  %v7565_v29 = vld [vmem:[#allocation20_spill] sm:$0xff] }
  0xcb   : > { %5491 = vmatprep.mubr.msk.f32.mxu1 %vm220_vm1, %v7560_v19 }
  0xcd   : > { %5542 = vmatmul.mubr.msk.f32.gmra.mxu0 %vm220_vm1, %v6056_v31  ;;  %v7566_v31 = vld [vmem:[#allocation21_spill] sm:$0xff] }
  0xce   : > { %5492 = vmatmul.mubr.msk.f32.gmra.mxu1 %vm220_vm1, %v7561_v21  ;;  %5544 = vmatprep.mubr.msk.f32.mxu0 %vm220_vm1, %v6062_v33  ;;  %v7567_v33 = vld [vmem:[#allocation22_spill] sm:$0xff] }
  0xcf   : > { %5494 = vmatprep.mubr.msk.f32.mxu1 %vm220_vm1, %v7562_v23 }
  0xd1   : > { %5545 = vmatmul.mubr.msk.f32.gmra.mxu0 %vm220_vm1, %v6076_v35  ;;  %v7568_v35 = vld [vmem:[#allocation23_spill] sm:$0xff] }
  0xd2   : > { %5495 = vmatmul.mubr.msk.f32.gmra.mxu1 %vm220_vm1, %v7563_v25  ;;  %5547 = vmatprep.mubr.msk.f32.mxu0 %vm220_vm1, %v5917_v4 }
  0xd3   : > { %5497 = vmatprep.mubr.msk.f32.mxu1 %vm220_vm1, %v7564_v27 }
  0xd5   : > { %5548 = vmatmul.mubr.msk.f32.gmra.mxu0 %vm220_vm1, %v5924_v6 }
  0xd6   : > { %5498 = vmatmul.mubr.msk.f32.gmra.mxu1 %vm220_vm1, %v7565_v29  ;;  %5550 = vmatprep.mubr.msk.f32.mxu0 %vm220_vm1, %v5930_v8  ;;  %v7570_v8 = vld [vmem:[#allocation25_spill] sm:$0xff] }
  0xd7   : > { %5500 = vmatprep.mubr.msk.f32.mxu1 %vm220_vm1, %v7566_v31 }
  0xd9   : > { %5551 = vmatmul.mubr.msk.f32.gmra.mxu0 %vm220_vm1, %v5951_v12 }
  0xda   : > { %5501 = vmatmul.mubr.msk.f32.gmra.mxu1 %vm220_vm1, %v7567_v33  ;;  %5553 = vmatprep.mubr.msk.f32.mxu0 %vm220_vm1, %v5961_v14 }
  0xdb   : > { %5503 = vmatprep.mubr.msk.f32.mxu1 %vm220_vm1, %v7568_v35 }
  0xdd   : > { %v6641_v4 = vpop.f32.mrf.mxu0  ;;  %5554 = vmatmul.mubr.msk.f32.gmra.mxu0 %vm220_vm1, %v5979_v16  ;;  %v7573_v16 = vld [vmem:[#allocation27_spill] sm:$0xff] }
  0xde   : > { %v6643_v6 = vpop.f32.mrf.mxu1  ;;  %5504 = vmatmul.mubr.msk.f32.gmra.mxu1 %vm220_vm1, %v7569_v10  ;;  %5556 = vmatprep.mubr.msk.f32.mxu0 %vm220_vm1, %v5985_v18 }
  0xdf   : > { %5506 = vmatprep.mubr.msk.f32.mxu1 %vm220_vm1, %v7570_v8  ;;  %v6653_v12 = vpop.f32.mrf.mxu0 }
  0xe0   : > { %v6655_v45 = vpop.f32.mrf.mxu1 }
  0xe1   : > { %v6657_v14 = vpop.f32.mrf.mxu0  ;;  %5557 = vmatmul.mubr.msk.f32.gmra.mxu0 %vm220_vm1, %v5999_v20  ;;  %v7577_v20 = vld [vmem:[#allocation30_spill] sm:$0xff] }
  0xe2   : > { %v6659_v44 = vpop.f32.mrf.mxu1  ;;  %5507 = vmatmul.mubr.msk.f32.gmra.mxu1 %vm220_vm1, %v7572_v11  ;;  %5559 = vmatprep.mubr.msk.f32.mxu0 %vm220_vm1, %v6005_v22 }
  0xe3   : > { %7571 = vst [vmem:[#allocation7_spill] sm:$0xff] %v6659_v44  ;;  %5509 = vmatprep.mubr.msk.f32.mxu1 %vm220_vm1, %v7573_v16  ;;  %v6669_v18 = vpop.f32.mrf.mxu0  ;;  %v7584_v44 = vld [vmem:[#allocation36_spill] sm:$0xff] }
  0xe4   : > { %v6671_v50 = vpop.f32.mrf.mxu1 }
  0xe5   : > { %7574 = vst [vmem:[#allocation8_spill] sm:$0xff] %v6671_v50  ;;  %v6673_v48 = vpop.f32.mrf.mxu0  ;;  %5560 = vmatmul.mubr.msk.f32.gmra.mxu0 %vm220_vm1, %v6019_v24  ;;  %v7581_v24 = vld [vmem:[#allocation34_spill] sm:$0xff] }
  0xe6   : > { %v6675_v54 = vpop.f32.mrf.mxu1  ;;  %5510 = vmatmul.mubr.msk.f32.gmra.mxu1 %vm220_vm1, %v7576_v52  ;;  %5562 = vmatprep.mubr.msk.f32.mxu0 %vm220_vm1, %v6025_v26 }
  0xe7   : > { %7575 = vst [vmem:[#allocation9_spill] sm:$0xff] %v6675_v54  ;;  %5512 = vmatprep.mubr.msk.f32.mxu1 %vm220_vm1, %v7577_v20  ;;  %v6685_v22 = vpop.f32.mrf.mxu0  ;;  %v7580_v54 = vld [vmem:[#allocation32_spill] sm:$0xff] }
  0xe8   : > { %v6687_v58 = vpop.f32.mrf.mxu1 }
  0xe9   : > { %7578 = vst [vmem:[#allocation10_spill] sm:$0xff] %v6687_v58  ;;  %v6689_v50 = vpop.f32.mrf.mxu0  ;;  %5563 = vmatmul.mubr.msk.f32.gmra.mxu0 %vm220_vm1, %v6039_v28  ;;  %v7585_v28 = vld [vmem:[#allocation38_spill] sm:$0xff] }
  0xea   : > { %v6691_v56 = vpop.f32.mrf.mxu1  ;;  %5513 = vmatmul.mubr.msk.f32.gmra.mxu1 %vm220_vm1, %v7580_v54  ;;  %5565 = vmatprep.mubr.msk.f32.mxu0 %vm220_vm1, %v6045_v30 }
  0xeb   : > { %7579 = vst [vmem:[#allocation11_spill] sm:$0xff] %v6691_v56  ;;  %5515 = vmatprep.mubr.msk.f32.mxu1 %vm220_vm1, %v7581_v24  ;;  %v6701_v26 = vpop.f32.mrf.mxu0 }
  0xec   : > { %v6703_v20 = vpop.f32.mrf.mxu1 }
  0xed   : > { %7582 = vst [vmem:[#allocation12_spill] sm:$0xff] %v6703_v20  ;;  %v6705_v58 = vpop.f32.mrf.mxu0  ;;  %5566 = vmatmul.mubr.msk.f32.gmra.mxu0 %vm220_vm1, %v6059_v32  ;;  %v7588_v32 = vld [vmem:[#allocation41_spill] sm:$0xff] }
  0xee   : > { %v6707_v56 = vpop.f32.mrf.mxu1  ;;  %5516 = vmatmul.mubr.msk.f32.gmra.mxu1 %vm220_vm1, %v7584_v44  ;;  %5568 = vmatprep.mubr.msk.f32.mxu0 %vm220_vm1, %v6065_v34 }
  0xef   : > { %7583 = vst [vmem:[#allocation13_spill] sm:$0xff] %v6707_v56  ;;  %5518 = vmatprep.mubr.msk.f32.mxu1 %vm220_vm1, %v7585_v28  ;;  %v6717_v30 = vpop.f32.mrf.mxu0  ;;  %v6738_v28 = vld [vmem:[%s5913_s9 + $0x182] sm:$0xff] }
  0xf0   : > { %v6719_v20 = vpop.f32.mrf.mxu1  ;;  %7590 = vst [vmem:[#allocation17_spill] sm:$0xff] %v6738_v28 }
  0xf1   : > { %7586 = vst [vmem:[#allocation14_spill] sm:$0xff] %v6719_v20  ;;  %v6721_v24 = vpop.f32.mrf.mxu0  ;;  %5569 = vmatmul.mubr.msk.f32.gmra.mxu0 %vm220_vm1, %v7550_v41  ;;  %v4756_v41 = vld [vmem:[%s5913_s9 + $0x1a0] sm:$0xff] }
  0xf2   : > { %v6723_v56 = vpop.f32.mrf.mxu1  ;;  %5519 = vmatmul.mubr.msk.f32.gmra.mxu1 %vm220_vm1, %v6385_v40  ;;  %5571 = vmatprep.mubr.msk.f32.mxu0 %vm220_vm1, %v6546_v7  ;;  %v7592_v40 = vld [vmem:[#allocation42_spill] sm:$0xff]  ;;  %v6753_v7 = vld [vmem:[%s5913_s9 + $0x18a] sm:$0xff] }
  0xf3   : > { %7587 = vst [vmem:[#allocation15_spill] sm:$0xff] %v6723_v56  ;;  %5521 = vmatprep.mubr.msk.f32.mxu1 %vm220_vm1, %v7588_v32  ;;  %v6733_v34 = vpop.f32.mrf.mxu0  ;;  %v4755_v56 = vld [vmem:[%s5913_s9 + $0x198] sm:$0xff]  ;;  %7593 = vst [vmem:[#allocation19_spill] sm:$0xff] %v6753_v7 }
  0xf4   : > { %v6735_v20 = vpop.f32.mrf.mxu1 }
  0xf5   : > { %7589 = vst [vmem:[#allocation16_spill] sm:$0xff] %v6735_v20  ;;  %v6741_v44 = vpop.f32.mrf.mxu0  ;;  %5572 = vmatmul.mubr.msk.f32.gmra.mxu0 %vm220_vm1, %v6560_v43 }
  0xf6   : > { %v6743_v54 = vpop.f32.mrf.mxu1  ;;  %5522 = vmatmul.mubr.msk.f32.gmra.mxu1 %vm220_vm1, %v7592_v40  ;;  %5574 = vmatprep.mubr.msk.f32.mxu0 %vm220_vm1, %v4755_v56 }
  0xf7   : > { %7591 = vst [vmem:[#allocation18_spill] sm:$0xff] %v6743_v54  ;;  %5524 = vmatprep.mubr.msk.f32.mxu1 %vm220_vm1, %v6738_v28  ;;  %v6756_v32 = vpop.f32.mrf.mxu0 }
  0xf8   : > { %v6758_v20 = vpop.f32.mrf.mxu1 }
  0xf9   : > { %7594 = vst [vmem:[#allocation20_spill] sm:$0xff] %v6758_v20  ;;  %v6760_v52 = vpop.f32.mrf.mxu0  ;;  %5575 = vmatmul.mubr.msk.f32.gmra.mxu0 %vm220_vm1, %v4756_v41 }
  0xfa   : > { %v6762_v54 = vpop.f32.mrf.mxu1  ;;  %5525 = vmatmul.mubr.msk.f32.gmra.mxu1 %vm220_vm1, %v6753_v7  ;;  %5629 = vmatprep.mubr.msk.f32.mxu0 %vm220_vm1, %v7554_v46 }
  0xfb   : > { %7595 = vst [vmem:[#allocation21_spill] sm:$0xff] %v6762_v54  ;;  %5579 = vmatprep.mubr.msk.f32.mxu1 %vm220_vm1, %v6124_v47  ;;  %v6771_v56 = vpop.f32.mrf.mxu0 }
  0xfc   : > { %v6773_v40 = vpop.f32.mrf.mxu1 }
  0xfd   : > { %7596 = vst [vmem:[#allocation22_spill] sm:$0xff] %v6773_v40  ;;  %v5331_v20 = vpop.f32.mrf.mxu0  ;;  %5630 = vmatmul.mubr.msk.f32.vlgmr.msra.gmra.mxu0 %vm220_vm1, %v7555_v42 }
  0xfe   : > { %v5281_v43 = vpop.f32.mrf.mxu1  ;;  %5580 = vmatmul.mubr.msk.f32.vlgmr.msra.gmra.mxu1 %vm220_vm1, %v6142_v49  ;;  %5632 = vmatprep.mubr.msk.f32.mxu0 %vm220_vm1, %v7556_v13 }
  0xff   : > { %v969_v41 = vadd.f32 %v5281_v43, %v6641_v4  ;;  %5582 = vmatprep.mubr.msk.f32.mxu1 %vm220_vm1, %v6148_v51  ;;  %v1231_v46 = vpop.f32.mrf.mxu0 }
 0x100   : > { %v777_v47 = vpop.f32.mrf.mxu1 }
 0x101   : > { %v6784_v54 = vadd.f32 %v5331_v20, %v969_v41  ;;  %v968_v40 = vadd.f32 %v777_v47, %v6653_v12  ;;  %v5334_v28 = vpop.f32.mrf.mxu0  ;;  %5633 = vmatmul.mubr.msk.f32.gmra.mxu0 %vm220_vm1, %v7557_v15 }
 0x102   : > { %v5284_v7 = vpop.f32.mrf.mxu1  ;;  %5583 = vmatmul.mubr.msk.f32.gmra.mxu1 %vm220_vm1, %v6162_v53  ;;  %5635 = vmatprep.mubr.msk.f32.mxu0 %vm220_vm1, %v7558_v36 }
 0x103   : > { %v6791_v49 = vadd.f32 %v1231_v46, %v968_v40  ;;  %v971_v51 = vadd.f32 %v5284_v7, %v6657_v14  ;;  %5585 = vmatprep.mubr.msk.f32.mxu1 %vm220_vm1, %v6168_v55  ;;  %v1241_v13 = vpop.f32.mrf.mxu0 }
 0x104   : > { %v787_v42 = vpop.f32.mrf.mxu1 }
 0x105   : > { %v6798_v4 = vadd.f32 %v5334_v28, %v971_v51  ;;  %v970_v12 = vadd.f32 %v787_v42, %v6669_v18  ;;  %v5337_v20 = vpop.f32.mrf.mxu0  ;;  %5636 = vmatmul.mubr.msk.f32.gmra.mxu0 %vm220_vm1, %v7559_v17 }
 0x106   : > { %v5287_v53 = vpop.f32.mrf.mxu1  ;;  %5586 = vmatmul.mubr.msk.f32.gmra.mxu1 %vm220_vm1, %v6182_v57  ;;  %5638 = vmatprep.mubr.msk.f32.mxu0 %vm220_vm1, %v7560_v19 }
 0x107   : > { %v6805_v15 = vadd.f32 %v1241_v13, %v970_v12  ;;  %v973_v55 = vadd.f32 %v5287_v53, %v6673_v48  ;;  %5588 = vmatprep.mubr.msk.f32.mxu1 %vm220_vm1, %v6188_v59  ;;  %v1251_v14 = vpop.f32.mrf.mxu0 }
 0x108   : > { %v797_v36 = vpop.f32.mrf.mxu1 }
 0x109   : > { %v6812_v18 = vadd.f32 %v5337_v20, %v973_v55  ;;  %v972_v28 = vadd.f32 %v797_v36, %v6685_v22  ;;  %v5340_v7 = vpop.f32.mrf.mxu0  ;;  %5639 = vmatmul.mubr.msk.f32.gmra.mxu0 %vm220_vm1, %v7561_v21 }
 0x10a   : > { %v5290_v57 = vpop.f32.mrf.mxu1  ;;  %5589 = vmatmul.mubr.msk.f32.gmra.mxu1 %vm220_vm1, %v6202_v61  ;;  %5641 = vmatprep.mubr.msk.f32.mxu0 %vm220_vm1, %v7562_v23 }
 0x10b   : > { %v6819_v48 = vadd.f32 %v1251_v14, %v972_v28  ;;  %v975_v59 = vadd.f32 %v5290_v57, %v6689_v50  ;;  %5591 = vmatprep.mubr.msk.f32.mxu1 %vm220_vm1, %v6208_v63  ;;  %v1261_v19 = vpop.f32.mrf.mxu0  ;;  %v7599_v14 = vld [vmem:[#allocation29_spill] sm:$0xff] }
 0x10c   : > { %v807_v17 = vpop.f32.mrf.mxu1 }
 0x10d   : > { %v6826_v22 = vadd.f32 %v5340_v7, %v975_v59  ;;  %v974_v40 = vadd.f32 %v807_v17, %v6701_v26  ;;  %v5343_v43 = vpop.f32.mrf.mxu0  ;;  %5642 = vmatmul.mubr.msk.f32.gmra.mxu0 %vm220_vm1, %v7563_v25  ;;  %v7601_v7 = vld [vmem:[#allocation8_spill] sm:$0xff] }
 0x10e   : > { %v5293_v61 = vpop.f32.mrf.mxu1  ;;  %5592 = vmatmul.mubr.msk.f32.gmra.mxu1 %vm220_vm1, %v6222_v1  ;;  %5644 = vmatprep.mubr.msk.f32.mxu0 %vm220_vm1, %v7564_v27 }
 0x10f   : > { %v6833_v50 = vadd.f32 %v1261_v19, %v974_v40  ;;  %v977_v63 = vadd.f32 %v5293_v61, %v6705_v58  ;;  %5594 = vmatprep.mubr.msk.f32.mxu1 %vm220_vm1, %v6228_v3  ;;  %v1271_v23 = vpop.f32.mrf.mxu0  ;;  %v7602_v19 = vld [vmem:[#allocation31_spill] sm:$0xff]  ;;  %v7603_v40 = vld [vmem:[#allocation32_spill] sm:$0xff] }
 0x110   : > { %v817_v21 = vpop.f32.mrf.mxu1 }
 0x111   : > { %v6840_v26 = vadd.f32 %v5343_v43, %v977_v63  ;;  %v976_v41 = vadd.f32 %v817_v21, %v6717_v30  ;;  %v5346_v47 = vpop.f32.mrf.mxu0  ;;  %5645 = vmatmul.mubr.msk.f32.gmra.mxu0 %vm220_vm1, %v7565_v29  ;;  %v7604_v43 = vld [vmem:[#allocation9_spill] sm:$0xff] }
 0x112   : > { %v5296_v1 = vpop.f32.mrf.mxu1  ;;  %5595 = vmatmul.mubr.msk.f32.gmra.mxu1 %vm220_vm1, %v6242_v9  ;;  %5647 = vmatprep.mubr.msk.f32.mxu0 %vm220_vm1, %v7566_v31  ;;  %v7605_v21 = vld [vmem:[#allocation33_spill] sm:$0xff] }
 0x113   : > { %v6847_v58 = vadd.f32 %v1271_v23, %v976_v41  ;;  %v979_v3 = vadd.f32 %v5296_v1, %v6721_v24  ;;  %5597 = vmatprep.mubr.msk.f32.mxu1 %vm220_vm1, %v6248_v37  ;;  %v1281_v27 = vpop.f32.mrf.mxu0  ;;  %v7606_v23 = vld [vmem:[#allocation34_spill] sm:$0xff] }
 0x114   : > { %v827_v25 = vpop.f32.mrf.mxu1 }
 0x115   : > { %v6854_v30 = vadd.f32 %v5346_v47, %v979_v3  ;;  %v978_v46 = vadd.f32 %v827_v25, %v6733_v34  ;;  %v5349_v51 = vpop.f32.mrf.mxu0  ;;  %5648 = vmatmul.mubr.msk.f32.gmra.mxu0 %vm220_vm1, %v7567_v33  ;;  %v7607_v3 = vld [vmem:[#allocation10_spill] sm:$0xff] }
 0x116   : > { %v5299_v9 = vpop.f32.mrf.mxu1  ;;  %5598 = vmatmul.mubr.msk.f32.gmra.mxu1 %vm220_vm1, %v6262_v39  ;;  %5650 = vmatprep.mubr.msk.f32.mxu0 %vm220_vm1, %v7568_v35 }
 0x117   : > { %v6861_v29 = vadd.f32 %v1281_v27, %v978_v46  ;;  %v981_v37 = vadd.f32 %v5299_v9, %v6741_v44  ;;  %5600 = vmatprep.mubr.msk.f32.mxu1 %vm220_vm1, %v6268_v5  ;;  %v1291_v24 = vpop.f32.mrf.mxu0  ;;  %v7608_v9 = vld [vmem:[#allocation35_spill] sm:$0xff] }
 0x118   : > { %v837_v31 = vpop.f32.mrf.mxu1 }
 0x119   : > { %v6868_v34 = vadd.f32 %v5349_v51, %v981_v37  ;;  %v980_v42 = vadd.f32 %v837_v31, %v6756_v32  ;;  %v5352_v13 = vpop.f32.mrf.mxu0  ;;  %5651 = vmatmul.mubr.msk.f32.gmra.mxu0 %vm220_vm1, %v7569_v10  ;;  %v7609_v51 = vld [vmem:[#allocation36_spill] sm:$0xff]  ;;  %v7610_v31 = vld [vmem:[#allocation11_spill] sm:$0xff] }
 0x11a   : > { %v5302_v39 = vpop.f32.mrf.mxu1  ;;  %5601 = vmatmul.mubr.msk.f32.gmra.mxu1 %vm220_vm1, %v6282_v38  ;;  %5653 = vmatprep.mubr.msk.f32.mxu0 %vm220_vm1, %v7570_v8 }
 0x11b   : > { %v6875_v44 = vadd.f32 %v1291_v24, %v980_v42  ;;  %v983_v5 = vadd.f32 %v5302_v39, %v6760_v52  ;;  %5603 = vmatprep.mubr.msk.f32.mxu1 %vm220_vm1, %v6288_v0  ;;  %v1301_v35 = vpop.f32.mrf.mxu0  ;;  %v7611_v42 = vld [vmem:[#allocation37_spill] sm:$0xff]  ;;  %v7612_v39 = vld [vmem:[#allocation38_spill] sm:$0xff] }
 0x11c   : > { %v847_v33 = vpop.f32.mrf.mxu1 }
 0x11d   : > { %v6882_v32 = vadd.f32 %v5352_v13, %v983_v5  ;;  %v982_v12 = vadd.f32 %v847_v33, %v6771_v56  ;;  %v5355_v53 = vpop.f32.mrf.mxu0  ;;  %5654 = vmatmul.mubr.msk.f32.gmra.mxu0 %vm220_vm1, %v7572_v11  ;;  %v7597_v11 = vld [vmem:[#allocation28_spill] sm:$0xff] }
 0x11e   : > { %v5305_v38 = vpop.f32.mrf.mxu1  ;;  %5604 = vmatmul.mubr.msk.f32.gmra.mxu1 %vm220_vm1, %v6302_v2  ;;  %5656 = vmatprep.mubr.msk.f32.mxu0 %vm220_vm1, %v7573_v16  ;;  %v7600_v16 = vld [vmem:[#allocation30_spill] sm:$0xff]  ;;  %v4817_v33 = vld [vmem:[%s5913_s9 + $0x169] sm:$0xff] }
 0x11f   : > { %v6889_v52 = vadd.f32 %v1301_v35, %v982_v12  ;;  %v985_v0 = vadd.f32 %v5305_v38, %v6643_v6  ;;  %5606 = vmatprep.mubr.msk.f32.mxu1 %vm220_vm1, %v6308_v60  ;;  %v1311_v8 = vpop.f32.mrf.mxu0  ;;  %v7598_v60 = vld [vmem:[#allocation7_spill] sm:$0xff]  ;;  %v7613_v38 = vld [vmem:[#allocation12_spill] sm:$0xff] }
 0x120   : > { %v857_v10 = vpop.f32.mrf.mxu1  ;;  %v4883_v35 = vld [vmem:[%s5913_s9 + $0x16a] sm:$0xff] }
 0x121   : > { %v6896_v56 = vadd.f32 %v5355_v53, %v985_v0  ;;  %v984_v20 = vadd.f32 %v857_v10, %v6655_v45  ;;  %v5358_v55 = vpop.f32.mrf.mxu0  ;;  %5657 = vmatmul.mubr.msk.f32.gmra.mxu0 %vm220_vm1, %v7597_v11 }
 0x122   : > { %v5308_v2 = vpop.f32.mrf.mxu1  ;;  %5607 = vmatmul.mubr.msk.f32.gmra.mxu1 %vm220_vm1, %v6322_v62  ;;  %5659 = vmatprep.mubr.msk.f32.mxu0 %vm220_vm1, %v7600_v16 }
 0x123   : > { %v6903_v6 = vadd.f32 %v1311_v8, %v984_v20  ;;  %v987_v36 = vadd.f32 %v5308_v2, %v7598_v60  ;;  %5609 = vmatprep.mubr.msk.f32.mxu1 %vm220_vm1, %v7599_v14  ;;  %v1321_v45 = vpop.f32.mrf.mxu0  ;;  %v7614_v8 = vld [vmem:[#allocation39_spill] sm:$0xff]  ;;  %v7615_v20 = vld [vmem:[#allocation40_spill] sm:$0xff] }
 0x124   : > { %v867_v28 = vpop.f32.mrf.mxu1  ;;  %v4818_v60 = vld [vmem:[%s5913_s9 + $0x171] sm:$0xff] }
 0x125   : > { %v6910_v57 = vadd.f32 %v5358_v55, %v987_v36  ;;  %v986_v59 = vadd.f32 %v867_v28, %v7601_v7  ;;  %v5361_v17 = vpop.f32.mrf.mxu0  ;;  %5660 = vmatmul.mubr.msk.f32.gmra.mxu0 %vm220_vm1, %v7603_v40  ;;  %v7616_v55 = vld [vmem:[#allocation13_spill] sm:$0xff] }
 0x126   : > { %v5311_v62 = vpop.f32.mrf.mxu1  ;;  %5610 = vmatmul.mubr.msk.f32.gmra.mxu1 %vm220_vm1, %v7602_v19  ;;  %5662 = vmatprep.mubr.msk.f32.mxu0 %vm220_vm1, %v7606_v23  ;;  %v4884_v36 = vld [vmem:[%s5913_s9 + $0x172] sm:$0xff]  ;;  %v7618_v19 = vld [vmem:[#allocation15_spill] sm:$0xff] }
 0x127   : > { %v6917_v61 = vadd.f32 %v1321_v45, %v986_v59  ;;  %v989_v63 = vadd.f32 %v5311_v62, %v7604_v43  ;;  %5612 = vmatprep.mubr.msk.f32.mxu1 %vm220_vm1, %v7605_v21  ;;  %v1331_v1 = vpop.f32.mrf.mxu0  ;;  %v7617_v45 = vld [vmem:[#allocation14_spill] sm:$0xff]  ;;  %v7619_v43 = vld [vmem:[#allocation43_spill] sm:$0xff] }
 0x128   : > { %v877_v41 = vpop.f32.mrf.mxu1 }
 0x129   : > { %v6924_v47 = vadd.f32 %v5361_v17, %v989_v63  ;;  %v988_v25 = vadd.f32 %v877_v41, %v7607_v3  ;;  %v5364_v46 = vpop.f32.mrf.mxu0  ;;  %5663 = vmatmul.mubr.msk.f32.gmra.mxu0 %vm220_vm1, %v7609_v51  ;;  %v7620_v63 = vld [vmem:[#allocation17_spill] sm:$0xff]  ;;  %v7622_v51 = vld [vmem:[#allocation6_spill] sm:$0xff] }
 0x12a   : > { %v5314_v27 = vpop.f32.mrf.mxu1  ;;  %5613 = vmatmul.mubr.msk.f32.gmra.mxu1 %vm220_vm1, %v7608_v9  ;;  %5665 = vmatprep.mubr.msk.f32.mxu0 %vm220_vm1, %v7612_v39  ;;  %v4821_v41 = vld [vmem:[%s5913_s9 + $0x199] sm:$0xff] }
 0x12b   : > { %v6931_v37 = vadd.f32 %v1331_v1, %v988_v25  ;;  %v991_v24 = vadd.f32 %v5314_v27, %v7610_v31  ;;  %5615 = vmatprep.mubr.msk.f32.mxu1 %vm220_vm1, %v7611_v42  ;;  %v1341_v5 = vpop.f32.mrf.mxu0  ;;  %v4887_v1 = vld [vmem:[%s5913_s9 + $0x19a] sm:$0xff]  ;;  %v7621_v25 = vld [vmem:[#allocation16_spill] sm:$0xff]  ;;  %v7623_v31 = vld [vmem:[#allocation19_spill] sm:$0xff] }
 0x12c   : > { %v887_v13 = vpop.f32.mrf.mxu1  ;;  %v7624_v42 = vld [vmem:[#allocation18_spill] sm:$0xff] }
 0x12d   : > { %v6940_v12 = vadd.f32 %v5364_v46, %v991_v24  ;;  %v990_v53 = vadd.f32 %v887_v13, %v7613_v38  ;;  %v5367_v10 = vpop.f32.mrf.mxu0  ;;  %5666 = vmatmul.mubr.msk.f32.gmra.mxu0 %vm220_vm1, %v7615_v20  ;;  %v4822_v13 = vld [vmem:[%s5913_s9 + $0x1a1] sm:$0xff] }
 0x12e   : > { %v5317_v0 = vpop.f32.mrf.mxu1  ;;  %5616 = vmatmul.mubr.msk.f32.gmra.mxu1 %vm220_vm1, %v7614_v8  ;;  %5668 = vmatprep.mubr.msk.f32.mxu0 %vm220_vm1, %v4883_v35 }
 0x12f   : > { %v6947_v2 = vadd.f32 %v1341_v5, %v990_v53  ;;  %v993_v11 = vadd.f32 %v5317_v0, %v7616_v55  ;;  %5618 = vmatprep.mubr.msk.f32.mxu1 %vm220_vm1, %v4817_v33  ;;  %v1351_v16 = vpop.f32.mrf.mxu0  ;;  %v4888_v5 = vld [vmem:[%s5913_s9 + $0x1a2] sm:$0xff]  ;;  %v7625_v53 = vld [vmem:[#allocation20_spill] sm:$0xff]  ;;  %v7626_v55 = vld [vmem:[#allocation21_spill] sm:$0xff]  ;;  %s7241_s9 = scalar_lea.vmem [#allocation3], %s4424_s6 }
 0x130   : > { %v897_v14 = vpop.f32.mrf.mxu1  ;;  %s4336_s11 = sshll.u32 %s7241_s9, 4  ;;  %s7387_s11 = int_to_ptr.vmem [resolvable:$true] %s4336_s11 }
 0x131   : > { %v6954_v28 = vadd.f32 %v5367_v10, %v993_v11  ;;  %v992_v7 = vadd.f32 %v897_v14, %v7617_v45  ;;  %v5370_v62 = vpop.f32.mrf.mxu0  ;;  %5669 = vmatmul.mubr.msk.f32.gmra.mxu0 %vm220_vm1, %v4884_v36  ;;  %s5737_s23 = scalar_lea.vmem %s7387_s11, 4096  ;;  %p5744_p1 = scmp.lt.s32.totalorder %s7387_s11, %s5742_s27 }
 0x132   : > { %v5320_v59 = vpop.f32.mrf.mxu1  ;;  %5619 = vmatmul.mubr.msk.f32.gmra.mxu1 %vm220_vm1, %v4818_v60  ;;  %5671 = vmatprep.mubr.msk.f32.mxu0 %vm220_vm1, %v7620_v63  ;;  %p5738_p12 = scmp.ne.s32.totalorder %s7387_s11, %s5737_s23  ;;  %p5745_p2 = scmp.lt.s32.totalorder %s5743_s28, %s5737_s23 }
 0x133   : > { %v6959_v17 = vadd.f32 %v1351_v16, %v992_v7  ;;  %v995_v40 = vadd.f32 %v5320_v59, %v7618_v19  ;;  %5621 = vmatprep.mubr.msk.f32.mxu1 %vm220_vm1, %v7619_v43  ;;  %v1361_v23 = vpop.f32.mrf.mxu0  ;;  %v7627_v16 = vld [vmem:[#allocation22_spill] sm:$0xff] }
 0x134   : > { %v907_v21 = vpop.f32.mrf.mxu1  ;;  %p5739_p13 = pnand %p5738_p12, %p5878_p4  ;;  %p5746_p3 = por %p5745_p2, %p5744_p1 }
 0x135   : > { %v6968_v3 = vadd.f32 %v5370_v62, %v995_v40  ;;  %v994_v27 = vadd.f32 %v907_v21, %v7621_v25  ;;  %v5373_v9 = vpop.f32.mrf.mxu0  ;;  %5672 = vmatmul.mubr.msk.f32.gmra.mxu0 %vm220_vm1, %v7623_v31 }
 0x136   : > { %v5323_v46 = vpop.f32.mrf.mxu1  ;;  %5622 = vmatmul.mubr.msk.f32.gmra.mxu1 %vm220_vm1, %v7622_v51  ;;  %5674 = vmatprep.mubr.msk.f32.mxu0 %vm220_vm1, %v4887_v1  ;;  %p5740_p0 = pneg %p5739_p13 }
 0x137   : > { %v6975_v24 = vadd.f32 %v1361_v23, %v994_v27  ;;  %v997_v39 = vadd.f32 %v5323_v46, %v7624_v42  ;;  %5624 = vmatprep.mubr.msk.f32.mxu1 %vm220_vm1, %v4821_v41  ;;  %v1371_v35 = vpop.f32.mrf.mxu0 }
 0x138   : > { %v917_v33 = vpop.f32.mrf.mxu1  ;;  %p5747_p5 = pnand %p5746_p3, %p5740_p0 }
 0x139   : > { %v6982_v38 = vadd.f32 %v5373_v9, %v997_v39  ;;  %v996_v0 = vadd.f32 %v917_v33, %v7625_v53  ;;  %v5376_v8 = vpop.f32.mrf.mxu0  ;;  %5675 = vmatmul.mubr.msk.f32.gmra.mxu0 %vm220_vm1, %v4888_v5 }
 0x13a   : > { %v5326_v10 = vpop.f32.mrf.mxu1  ;;  %5625 = vmatmul.mubr.msk.f32.gmra.mxu1 %vm220_vm1, %v4822_v13 }
 0x13b   : > { %v6987_v20 = vadd.f32 %v1371_v35, %v996_v0  ;;  %v999_v11 = vadd.f32 %v5326_v10, %v7626_v55  ;;  %v1381_v36 = vpop.f32.mrf.mxu0 }
 0x13c   : > { %v927_v60 = vpop.f32.mrf.mxu1 }
 0x13d   : > { %v6990_v14 = vadd.f32 %v5376_v8, %v999_v11  ;;  %v998_v45 = vadd.f32 %v927_v60, %v7627_v16  ;;  %v5431_v59 = vpop.f32.mrf.mxu0 }
 0x13e   : > { %v5381_v7 = vpop.f32.mrf.mxu1 }
 0x13f   : > { %v6993_v62 = vadd.f32 %v1381_v36, %v998_v45  ;;  %v1880_v19 = vadd.f32 %v5381_v7, %v6784_v54  ;;  %v2142_v43 = vpop.f32.mrf.mxu0 }
 0x140   : > { %v1688_v40 = vpop.f32.mrf.mxu1 }
 0x141   : > { %v6996_v63 = vadd.f32 %v5431_v59, %v1880_v19  ;;  %v1879_v21 = vadd.f32 %v1688_v40, %v6791_v49  ;;  %v5434_v41 = vpop.f32.mrf.mxu0 }
 0x142   : > { %v5384_v23 = vpop.f32.mrf.mxu1 }
 0x143   : > { %v6999_v1 = vadd.f32 %v2142_v43, %v1879_v21  ;;  %v1882_v25 = vadd.f32 %v5384_v23, %v6798_v4  ;;  %v2152_v46 = vpop.f32.mrf.mxu0 }
 0x144   : > { %v1698_v27 = vpop.f32.mrf.mxu1 }
 0x145   : > { %v7002_v9 = vadd.f32 %v5434_v41, %v1882_v25  ;;  %v1881_v51 = vadd.f32 %v1698_v27, %v6805_v15  ;;  %v5437_v54 = vpop.f32.mrf.mxu0 }
 0x146   : > { %v5387_v31 = vpop.f32.mrf.mxu1 }
 0x147   : > { %v7005_v42 = vadd.f32 %v2152_v46, %v1881_v51  ;;  %v1884_v39 = vadd.f32 %v5387_v31, %v6812_v18  ;;  %v2162_v49 = vpop.f32.mrf.mxu0 }
 0x148   : > { %v1708_v13 = vpop.f32.mrf.mxu1 }
 0x149   : > { %v7008_v5 = vadd.f32 %v5437_v54, %v1884_v39  ;;  %v1883_v33 = vadd.f32 %v1708_v13, %v6819_v48  ;;  %v5440_v4 = vpop.f32.mrf.mxu0 }
 0x14a   : > { %v5390_v35 = vpop.f32.mrf.mxu1 }
 0x14b   : > { %v7011_v53 = vadd.f32 %v2162_v49, %v1883_v33  ;;  %v1886_v0 = vadd.f32 %v5390_v35, %v6826_v22  ;;  %v2172_v15 = vpop.f32.mrf.mxu0 }
 0x14c   : > { %v1718_v10 = vpop.f32.mrf.mxu1 }
 0x14d   : > { %v7014_v8 = vadd.f32 %v5440_v4, %v1886_v0  ;;  %v1885_v55 = vadd.f32 %v1718_v10, %v6833_v50  ;;  %v5443_v18 = vpop.f32.mrf.mxu0 }
 0x14e   : > { %v5393_v11 = vpop.f32.mrf.mxu1 }
 0x14f   : > { %v7017_v60 = vadd.f32 %v2172_v15, %v1885_v55  ;;  %v1888_v36 = vadd.f32 %v5393_v11, %v6840_v26  ;;  %v2182_v48 = vpop.f32.mrf.mxu0 }
 0x150   : > { %v1728_v16 = vpop.f32.mrf.mxu1 }
 0x151   : > { %v7020_v45 = vadd.f32 %v5443_v18, %v1888_v36  ;;  %v1887_v7 = vadd.f32 %v1728_v16, %v6847_v58  ;;  %v5446_v22 = vpop.f32.mrf.mxu0 }
 0x152   : > { %v5396_v59 = vpop.f32.mrf.mxu1 }
 0x153   : > { %v7023_v19 = vadd.f32 %v2182_v48, %v1887_v7  ;;  %v1890_v40 = vadd.f32 %v5396_v59, %v6854_v30  ;;  %v2192_v50 = vpop.f32.mrf.mxu0 }
 0x154   : > { %v1738_v43 = vpop.f32.mrf.mxu1 }
 0x155   : > { %v7026_v21 = vadd.f32 %v5446_v22, %v1890_v40  ;;  %v1889_v23 = vadd.f32 %v1738_v43, %v6861_v29  ;;  %v5449_v26 = vpop.f32.mrf.mxu0 }
 0x156   : > { %v5399_v41 = vpop.f32.mrf.mxu1 }
 0x157   : > { %v7029_v25 = vadd.f32 %v2192_v50, %v1889_v23  ;;  %v1892_v27 = vadd.f32 %v5399_v41, %v6868_v34  ;;  %v2202_v58 = vpop.f32.mrf.mxu0 }
 0x158   : > { %v1748_v46 = vpop.f32.mrf.mxu1 }
 0x159   : > { %v7032_v51 = vadd.f32 %v5449_v26, %v1892_v27  ;;  %v1891_v31 = vadd.f32 %v1748_v46, %v6875_v44  ;;  %v5452_v30 = vpop.f32.mrf.mxu0 }
 0x15a   : > { %v5402_v54 = vpop.f32.mrf.mxu1 }
 0x15b   : > { %v7035_v39 = vadd.f32 %v2202_v58, %v1891_v31  ;;  %v1894_v13 = vadd.f32 %v5402_v54, %v6882_v32  ;;  %v2212_v29 = vpop.f32.mrf.mxu0 }
 0x15c   : > { %v1758_v49 = vpop.f32.mrf.mxu1 }
 0x15d   : > { %v7038_v33 = vadd.f32 %v5452_v30, %v1894_v13  ;;  %v1893_v35 = vadd.f32 %v1758_v49, %v6889_v52  ;;  %v5455_v34 = vpop.f32.mrf.mxu0 }
 0x15e   : > { %v5405_v4 = vpop.f32.mrf.mxu1 }
 0x15f   : > { %v7041_v0 = vadd.f32 %v2212_v29, %v1893_v35  ;;  %v1896_v10 = vadd.f32 %v5405_v4, %v6896_v56  ;;  %v2222_v44 = vpop.f32.mrf.mxu0 }
 0x160   : > { %v1768_v15 = vpop.f32.mrf.mxu1 }
 0x161   : > { %v7044_v55 = vadd.f32 %v5455_v34, %v1896_v10  ;;  %v1895_v11 = vadd.f32 %v1768_v15, %v6903_v6  ;;  %v5458_v32 = vpop.f32.mrf.mxu0 }
 0x162   : > { %v5408_v18 = vpop.f32.mrf.mxu1 }
 0x163   : > { %v7047_v36 = vadd.f32 %v2222_v44, %v1895_v11  ;;  %v1898_v16 = vadd.f32 %v5408_v18, %v6910_v57  ;;  %v2232_v52 = vpop.f32.mrf.mxu0 }
 0x164   : > { %v1778_v48 = vpop.f32.mrf.mxu1 }
 0x165   : > { %v7050_v7 = vadd.f32 %v5458_v32, %v1898_v16  ;;  %v1897_v59 = vadd.f32 %v1778_v48, %v6917_v61  ;;  %v5461_v56 = vpop.f32.mrf.mxu0 }
 0x166   : > { %v5411_v22 = vpop.f32.mrf.mxu1 }
 0x167   : > { %7628 = vst [vmem:[#allocation23_spill] sm:$0xff] %v7050_v7  ;;  %v7053_v40 = vadd.f32 %v2232_v52, %v1897_v59  ;;  %v1900_v43 = vadd.f32 %v5411_v22, %v6924_v47  ;;  %v2242_v6 = vpop.f32.mrf.mxu0 }
 0x168   : > { %v1788_v50 = vpop.f32.mrf.mxu1 }
 0x169   : > { %7629 = vst [vmem:[#allocation24_spill] sm:$0xff] %v7053_v40  ;;  %v7056_v23 = vadd.f32 %v5461_v56, %v1900_v43  ;;  %v1899_v41 = vadd.f32 %v1788_v50, %v6931_v37  ;;  %v5464_v57 = vpop.f32.mrf.mxu0 }
 0x16a   : > { %v5414_v26 = vpop.f32.mrf.mxu1 }
 0x16b   : > { %7630 = vst [vmem:[#allocation25_spill] sm:$0xff] %v7056_v23  ;;  %v7059_v27 = vadd.f32 %v2242_v6, %v1899_v41  ;;  %v1902_v46 = vadd.f32 %v5414_v26, %v6940_v12  ;;  %v2252_v61 = vpop.f32.mrf.mxu0 }
 0x16c   : > { %v1798_v58 = vpop.f32.mrf.mxu1 }
 0x16d   : > { %7631 = vst [vmem:[#allocation26_spill] sm:$0xff] %v7059_v27  ;;  %v7062_v31 = vadd.f32 %v5464_v57, %v1902_v46  ;;  %v1901_v54 = vadd.f32 %v1798_v58, %v6947_v2  ;;  %v5467_v47 = vpop.f32.mrf.mxu0 }
 0x16e   : > { %v5417_v30 = vpop.f32.mrf.mxu1 }
 0x16f   : > { %7632 = vst [vmem:[#allocation27_spill] sm:$0xff] %v7062_v31  ;;  %v7065_v13 = vadd.f32 %v2252_v61, %v1901_v54  ;;  %v1904_v49 = vadd.f32 %v5417_v30, %v6954_v28  ;;  %v2262_v37 = vpop.f32.mrf.mxu0 }
 0x170   : > { %v1808_v29 = vpop.f32.mrf.mxu1 }
 0x171   : > { %7633 = vst [vmem:[#allocation41_spill] sm:$0xff] %v7065_v13  ;;  %v7068_v35 = vadd.f32 %v5467_v47, %v1904_v49  ;;  %v1903_v4 = vadd.f32 %v1808_v29, %v6959_v17  ;;  %v5470_v12 = vpop.f32.mrf.mxu0 }
 0x172   : > { %v5420_v34 = vpop.f32.mrf.mxu1 }
 0x173   : > { %7634 = vst [vmem:[#allocation42_spill] sm:$0xff] %v7068_v35  ;;  %v7071_v10 = vadd.f32 %v2262_v37, %v1903_v4  ;;  %v1906_v15 = vadd.f32 %v5420_v34, %v6968_v3  ;;  %v2272_v2 = vpop.f32.mrf.mxu0 }
 0x174   : > { %v1818_v44 = vpop.f32.mrf.mxu1 }
 0x175   : > { %7635 = vst [vmem:[#allocation28_spill] sm:$0xff] %v7071_v10  ;;  %v7074_v11 = vadd.f32 %v5470_v12, %v1906_v15  ;;  %v1905_v18 = vadd.f32 %v1818_v44, %v6975_v24  ;;  %v5473_v28 = vpop.f32.mrf.mxu0 }
 0x176   : > { %v5423_v32 = vpop.f32.mrf.mxu1 }
 0x177   : > { %7636 = vst [vmem:[#allocation7_spill] sm:$0xff] %v7074_v11  ;;  %v7077_v16 = vadd.f32 %v2272_v2, %v1905_v18  ;;  %v1908_v48 = vadd.f32 %v5423_v32, %v6982_v38  ;;  %v2282_v17 = vpop.f32.mrf.mxu0 }
 0x178   : > { %v1828_v52 = vpop.f32.mrf.mxu1 }
 0x179   : > { %7637 = vst [vmem:[#allocation29_spill] sm:$0xff] %v7077_v16  ;;  %v7080_v59 = vadd.f32 %v5473_v28, %v1908_v48  ;;  %v1907_v22 = vadd.f32 %v1828_v52, %v6987_v20  ;;  %v5476_v3 = vpop.f32.mrf.mxu0 }
 0x17a   : > { %v5426_v56 = vpop.f32.mrf.mxu1 }
 0x17b   : > { %7638 = vst [vmem:[#allocation30_spill] sm:$0xff] %v7080_v59  ;;  %v7083_v43 = vadd.f32 %v2282_v17, %v1907_v22  ;;  %v1910_v50 = vadd.f32 %v5426_v56, %v6990_v14  ;;  %v2292_v24 = vpop.f32.mrf.mxu0 }
 0x17c   : > { %v1838_v6 = vpop.f32.mrf.mxu1 }
 0x17d   : > { %7639 = vst [vmem:[#allocation8_spill] sm:$0xff] %v7083_v43  ;;  %v7086_v41 = vadd.f32 %v5476_v3, %v1910_v50  ;;  %v1909_v26 = vadd.f32 %v1838_v6, %v6993_v62  ;;  %v7089_v38 = vpop.f32.mrf.mxu0 }
 0x17e   : > { %v5481_v57 = vpop.f32.mrf.mxu1 }
 0x17f   : > { %7640 = vst [vmem:[#allocation31_spill] sm:$0xff] %v7086_v41  ;;  %v7091_v46 = vadd.f32 %v2292_v24, %v1909_v26  ;;  %v7093_v61 = vpop.f32.mrf.mxu0 }
 0x180   : > { %v2596_v58 = vpop.f32.mrf.mxu1 }
 0x181   : > { %7641 = vst [vmem:[#allocation32_spill] sm:$0xff] %v7091_v46  ;;  %v7097_v54 = vpop.f32.mrf.mxu0 }
 0x182   : > { %v7095_v20 = vpop.f32.mrf.mxu1 }
 0x183   : > { %v7101_v14 = vpop.f32.mrf.mxu0 }
 0x184   : > { %v7099_v30 = vpop.f32.mrf.mxu1 }
 0x185   : > { %v7105_v49 = vpop.f32.mrf.mxu0 }
 0x186   : > { %v7103_v47 = vpop.f32.mrf.mxu1 }
 0x187   : > { %v7109_v29 = vpop.f32.mrf.mxu0 }
 0x188   : > { %v7107_v62 = vpop.f32.mrf.mxu1 }
 0x189   : > { %v7113_v4 = vpop.f32.mrf.mxu0 }
 0x18a   : > { %v7111_v37 = vpop.f32.mrf.mxu1 }
 0x18b   : > { %v7117_v12 = vpop.f32.mrf.mxu0 }
 0x18c   : > { %v7115_v34 = vpop.f32.mrf.mxu1 }
 0x18d   : > { %v7121_v44 = vpop.f32.mrf.mxu0 }
 0x18e   : > { %v7119_v15 = vpop.f32.mrf.mxu1 }
 0x18f   : > { %v7125_v18 = vpop.f32.mrf.mxu0 }
 0x190   : > { %v7123_v2 = vpop.f32.mrf.mxu1 }
 0x191   : > { %v7129_v28 = vpop.f32.mrf.mxu0 }
 0x192   : > { %v7127_v32 = vpop.f32.mrf.mxu1 }
 0x193   : > { %v7133_v52 = vpop.f32.mrf.mxu0 }
 0x194   : > { %v7131_v48 = vpop.f32.mrf.mxu1 }
 0x195   : > { %v7137_v22 = vpop.f32.mrf.mxu0 }
 0x196   : > { %v7135_v17 = vpop.f32.mrf.mxu1 }
 0x197   : > { %v7141_v3 = vpop.f32.mrf.mxu0 }
 0x198   : > { %v7139_v56 = vpop.f32.mrf.mxu1 }
 0x199   : > { %v7145_v6 = vpop.f32.mrf.mxu0 }
 0x19a   : > { %v7143_v50 = vpop.f32.mrf.mxu1 }
 0x19b   : > { %v7149_v26 = vpop.f32.mrf.mxu0 }
 0x19c   : > { %v7147_v24 = vpop.f32.mrf.mxu1 }
 0x19d   : > { %v7153_v41 = vpop.f32.mrf.mxu0 }
 0x19e   : > { %v7151_v46 = vpop.f32.mrf.mxu1 }
 0x19f   : > { %v7157_v59 = vpop.f32.mrf.mxu0 }
 0x1a0   : > { %v7155_v43 = vpop.f32.mrf.mxu1  ;;  %7642 = vst [vmem:[#allocation9_spill] sm:$0xff] %v7157_v59 }
 0x1a1   : > { %v7161_v11 = vpop.f32.mrf.mxu0 }
 0x1a2   : > { %v7159_v16 = vpop.f32.mrf.mxu1  ;;  %7644 = vst [vmem:[#allocation34_spill] sm:$0xff] %v7161_v11 }
 0x1a3   : > { %7643 = vst [vmem:[#allocation33_spill] sm:$0xff] %v7159_v16  ;;  %v7165_v35 = vpop.f32.mrf.mxu0 }
 0x1a4   : > { %v7163_v10 = vpop.f32.mrf.mxu1  ;;  %7646 = vst [vmem:[#allocation35_spill] sm:$0xff] %v7165_v35 }
 0x1a5   : > { %7645 = vst [vmem:[#allocation10_spill] sm:$0xff] %v7163_v10  ;;  %v7169_v31 = vpop.f32.mrf.mxu0 }
 0x1a6   : > { %v7167_v13 = vpop.f32.mrf.mxu1  ;;  %7647 = vst [vmem:[#allocation36_spill] sm:$0xff] %v7169_v31 }
 0x1a7   : > { %v7173_v23 = vpop.f32.mrf.mxu0 }
 0x1a8   : > { %v7171_v27 = vpop.f32.mrf.mxu1  ;;  %7649 = vst [vmem:[#allocation37_spill] sm:$0xff] %v7173_v23 }
 0x1a9   : > { %7648 = vst [vmem:[#allocation11_spill] sm:$0xff] %v7171_v27  ;;  %v7177_v7 = vpop.f32.mrf.mxu0 }
 0x1aa   : > { %v7175_v40 = vpop.f32.mrf.mxu1  ;;  %7651 = vst [vmem:[#allocation12_spill] sm:$0xff] %v7177_v7 }
 0x1ab   : > { %7650 = vst [vmem:[#allocation38_spill] sm:$0xff] %v7175_v40  ;;  %v7181_v16 = vpop.f32.mrf.mxu0 }
 0x1ac   : > { %v7179_v59 = vpop.f32.mrf.mxu1  ;;  %7653 = vst [vmem:[#allocation40_spill] sm:$0xff] %v7181_v16 }
 0x1ad   : > { %7652 = vst [vmem:[#allocation39_spill] sm:$0xff] %v7179_v59  ;;  %v7185_v10 = vpop.f32.mrf.mxu0 }
 0x1ae   : > { %v7183_v11 = vpop.f32.mrf.mxu1  ;;  %7655 = vst [vmem:[#allocation14_spill] sm:$0xff] %v7185_v10 }
 0x1af   : > { %7654 = vst [vmem:[#allocation13_spill] sm:$0xff] %v7183_v11  ;;  %v7189_v31 = vpop.f32.mrf.mxu0 }
 0x1b0   : > { %v7187_v35 = vpop.f32.mrf.mxu1  ;;  %7657 = vst [vmem:[#allocation43_spill] sm:$0xff] %v7189_v31 }
 0x1b1   : > { %7656 = vst [vmem:[#allocation15_spill] sm:$0xff] %v7187_v35  ;;  %v7193_v23 = vpop.f32.mrf.mxu0  ;;  %v2788_v35 = vadd.f32 %v5481_v57, %v6996_v63  ;;  %v2789_v57 = vadd.f32 %v7099_v30, %v7005_v42  ;;  %v2791_v42 = vadd.f32 %v7107_v62, %v7011_v53 }
 0x1b2   : > { %v7191_v27 = vpop.f32.mrf.mxu1  ;;  %7659 = vst [vmem:[#allocation16_spill] sm:$0xff] %v7193_v23  ;;  %v2787_v23 = vadd.f32 %v2596_v58, %v6999_v1  ;;  %v2792_v1 = vadd.f32 %v7103_v47, %v7008_v5 }
 0x1b3   : > { %7658 = vst [vmem:[#allocation17_spill] sm:$0xff] %v7191_v27  ;;  %v7197_v7 = vpop.f32.mrf.mxu0 }
 0x1b4   : > { %v7195_v40 = vpop.f32.mrf.mxu1  ;;  %7661 = vst [vmem:[#allocation19_spill] sm:$0xff] %v7197_v7  ;;  %v3244_v63 = vadd.f32 %v7093_v61, %v2787_v23  ;;  %v3246_v61 = vadd.f32 %v7101_v14, %v2789_v57  ;;  %v2796_v57 = vadd.f32 %v7119_v15, %v7020_v45 }
 0x1b5   : > { %7660 = vst [vmem:[#allocation6_spill] sm:$0xff] %v7195_v40  ;;  %v7201_v16 = vpop.f32.mrf.mxu0 }
 0x1b6   : > { %v7199_v59 = vpop.f32.mrf.mxu1  ;;  %7663 = vst [vmem:[#allocation20_spill] sm:$0xff] %v7201_v16  ;;  %v3245_v16 = vadd.f32 %v7089_v38, %v2788_v35  ;;  %v7231_v35 = vld [vmem:[%s7441_s2] ss:$0 sm:$0xff] }
 0x1b7   : > { %7662 = vst [vmem:[#allocation18_spill] sm:$0xff] %v7199_v59  ;;  %v7205_v10 = vpop.f32.mrf.mxu0 }
 0x1b8   : > { %v7203_v11 = vpop.f32.mrf.mxu1  ;;  %7665 = vst [vmem:[#allocation22_spill] sm:$0xff] %v7205_v10 }
 0x1b9   : > { %7664 = vst [vmem:[#allocation21_spill] sm:$0xff] %v7203_v11  ;;  %v7210_v27 = vpop.f32.mrf.mxu0  ;;  %v2790_v11 = vadd.f32 %v7095_v20, %v7002_v9 }
 0x1ba   : > { %v7208_v31 = vpop.f32.mrf.mxu1  ;;  %7667 = vst [vmem:[#allocation45_spill] sm:$0xff] %v7210_v27 }
 0x1bb   : > { %7666 = vst [vmem:[#allocation44_spill] sm:$0xff] %v7208_v31  ;;  %v7215_v7 = vpop.f32.mrf.mxu0  ;;  %v3247_v58 = vadd.f32 %v7097_v54, %v2790_v11  ;;  %v2794_v11 = vadd.f32 %v7111_v37, %v7014_v8  ;;  %v3248_v54 = vadd.f32 %v7109_v29, %v2791_v42 }
 0x1bc   : > { %v7213_v40 = vpop.f32.mrf.mxu1  ;;  %7669 = vst [vmem:[#allocation47_spill] sm:$0xff] %v7215_v7  ;;  %v3249_v7 = vadd.f32 %v7105_v49, %v2792_v1  ;;  %v2793_v49 = vadd.f32 %v7115_v34, %v7017_v60  ;;  %v2795_v60 = vadd.f32 %v7123_v2, %v7023_v19 }
 0x1bd   : > { %7668 = vst [vmem:[#allocation46_spill] sm:$0xff] %v7213_v40  ;;  %v5631_v10 = vpop.f32.mrf.mxu0 }
 0x1be   : > { %v5581_v59 = vpop.f32.mrf.mxu1 }
 0x1bf   : > { %v3699_v27 = vadd.f32 %v5581_v59, %v3245_v16  ;;  %v3961_v9 = vpop.f32.mrf.mxu0 }
 0x1c0   : > { %v3507_v38 = vpop.f32.mrf.mxu1 }
 0x1c1   : > { %v4153_v20 = vadd.f32 %v5631_v10, %v3699_v27  ;;  %v3698_v23 = vadd.f32 %v3507_v38, %v3244_v63  ;;  %v5634_v59 = vpop.f32.mrf.mxu0 }
 0x1c2   : > { %v5584_v16 = vpop.f32.mrf.mxu1 }
 0x1c3   : > { %v4256_v5 = vadd.f32 %v7231_v35, %v4153_v20  ;;  %v4152_v30 = vadd.f32 %v3961_v9, %v3698_v23  ;;  %v3701_v47 = vadd.f32 %v5584_v16, %v3247_v58  ;;  %v3971_v31 = vpop.f32.mrf.mxu0  ;;  %v2798_v16 = vadd.f32 %v7127_v32, %v7026_v21 }
 0x1c4   : > { %v3517_v40 = vpop.f32.mrf.mxu1  ;;  %v2800_v21 = vadd.f32 %v7135_v17, %v7032_v51 }
 0x1c5   : > { %4288 = vst [vmem:[%s7241_s9 + $0x8] sm:$0xff] %v4256_v5  ;;  %v4255_v53 = vadd.f32 %v7231_v35, %v4152_v30  ;;  %v4155_v27 = vadd.f32 %v5634_v59, %v3701_v47  ;;  %v3700_v10 = vadd.f32 %v3517_v40, %v3246_v61  ;;  %v5637_v62 = vpop.f32.mrf.mxu0  ;;  %v3251_v40 = vadd.f32 %v7113_v4, %v2794_v11 }
 0x1c6   : > { %v5587_v14 = vpop.f32.mrf.mxu1  ;;  %v3253_v4 = vadd.f32 %v7121_v44, %v2796_v57  ;;  %v2797_v30 = vadd.f32 %v7131_v48, %v7029_v25  ;;  %v2799_v25 = vadd.f32 %v7139_v56, %v7035_v39 }
 0x1c7   : > { %4287 = vst [vmem:[%s7241_s9] sm:$0xff] %v4255_v53  ;;  %v4258_v8 = vadd.f32 %v7231_v35, %v4155_v27  ;;  %v4154_v37 = vadd.f32 %v3971_v31, %v3700_v10  ;;  %v3703_v63 = vadd.f32 %v5587_v14, %v3249_v7  ;;  %v3981_v38 = vpop.f32.mrf.mxu0  ;;  %v3250_v7 = vadd.f32 %v7117_v12, %v2793_v49 }
 0x1c8   : > { %v3527_v1 = vpop.f32.mrf.mxu1  ;;  %v3252_v12 = vadd.f32 %v7125_v18, %v2795_v60  ;;  %v3255_v27 = vadd.f32 %v7129_v28, %v2798_v16  ;;  %v3257_v28 = vadd.f32 %v7137_v22, %v2800_v21 }
 0x1c9   : > { %4290 = vst [vmem:[%s7241_s9 + $0x18] sm:$0xff] %v4258_v8  ;;  %v4257_v29 = vadd.f32 %v7231_v35, %v4154_v37  ;;  %v4157_v9 = vadd.f32 %v5637_v62, %v3703_v63  ;;  %v3702_v58 = vadd.f32 %v3527_v1, %v3248_v54  ;;  %v5640_v20 = vpop.f32.mrf.mxu0  ;;  %v3254_v62 = vadd.f32 %v7133_v52, %v2797_v30 }
 0x1ca   : > { %v5590_v34 = vpop.f32.mrf.mxu1  ;;  %v2802_v63 = vadd.f32 %v7143_v50, %v7038_v33  ;;  %v3256_v52 = vadd.f32 %v7141_v3, %v2799_v25  ;;  %v2804_v33 = vadd.f32 %v7151_v46, %v7044_v55 }
 0x1cb   : > { %4289 = vst [vmem:[%s7241_s9 + $0x10] sm:$0xff] %v4257_v29  ;;  %v4260_v45 = vadd.f32 %v7231_v35, %v4157_v9  ;;  %v4156_v31 = vadd.f32 %v3981_v38, %v3702_v58  ;;  %v3705_v15 = vadd.f32 %v5590_v34, %v3251_v40  ;;  %v3991_v42 = vpop.f32.mrf.mxu0  ;;  %v2801_v40 = vadd.f32 %v7147_v24, %v7041_v0 }
 0x1cc   : > { %v3537_v23 = vpop.f32.mrf.mxu1  ;;  %v3259_v60 = vadd.f32 %v7145_v6, %v2802_v63  ;;  %v2803_v0 = vadd.f32 %v7155_v43, %v7047_v36  ;;  %v3261_v6 = vadd.f32 %v7153_v41, %v2804_v33  ;;  %v7680_v63 = vld [vmem:[#allocation36_spill] sm:$0xff] }
 0x1cd   : > { %4292 = vst [vmem:[%s7241_s9 + $0x28] sm:$0xff] %v4260_v45  ;;  %v4259_v19 = vadd.f32 %v7231_v35, %v4156_v31  ;;  %v4159_v2 = vadd.f32 %v5640_v20, %v3705_v15  ;;  %v3704_v59 = vadd.f32 %v3537_v23, %v3250_v7  ;;  %v5643_v5 = vpop.f32.mrf.mxu0  ;;  %v3258_v45 = vadd.f32 %v7149_v26, %v2801_v40  ;;  %v7670_v23 = vld [vmem:[#allocation23_spill] sm:$0xff]  ;;  %v7672_v26 = vld [vmem:[#allocation9_spill] sm:$0xff] }
 0x1ce   : > { %v5593_v61 = vpop.f32.mrf.mxu1 }
 0x1cf   : > { %4291 = vst [vmem:[%s7241_s9 + $0x20] sm:$0xff] %v4259_v19  ;;  %v4262_v44 = vadd.f32 %v7231_v35, %v4159_v2  ;;  %v4158_v47 = vadd.f32 %v3991_v42, %v3704_v59  ;;  %v3707_v11 = vadd.f32 %v5593_v61, %v3253_v4  ;;  %v4001_v53 = vpop.f32.mrf.mxu0  ;;  %v7671_v42 = vld [vmem:[#allocation33_spill] sm:$0xff]  ;;  %v3260_v2 = vadd.f32 %v7672_v26, %v2803_v0  ;;  %v7673_v61 = vld [vmem:[#allocation24_spill] sm:$0xff] }
 0x1d0   : > { %v3547_v32 = vpop.f32.mrf.mxu1  ;;  %v2806_v16 = vadd.f32 %v7671_v42, %v7670_v23 }
 0x1d1   : > { %4294 = vst [vmem:[%s7241_s9 + $0x38] sm:$0xff] %v4262_v44  ;;  %v4261_v18 = vadd.f32 %v7231_v35, %v4158_v47  ;;  %v4161_v10 = vadd.f32 %v5643_v5, %v3707_v11  ;;  %v3706_v54 = vadd.f32 %v3547_v32, %v3252_v12  ;;  %v5646_v14 = vpop.f32.mrf.mxu0  ;;  %v7674_v5 = vld [vmem:[#allocation10_spill] sm:$0xff]  ;;  %v7675_v11 = vld [vmem:[#allocation25_spill] sm:$0xff] }
 0x1d2   : > { %v5596_v48 = vpop.f32.mrf.mxu1  ;;  %v2805_v30 = vadd.f32 %v7674_v5, %v7673_v61  ;;  %v2808_v21 = vadd.f32 %v7167_v13, %v7675_v11  ;;  %v7693_v11 = vld [vmem:[#allocation7_spill] sm:$0xff] }
 0x1d3   : > { %4293 = vst [vmem:[%s7241_s9 + $0x30] sm:$0xff] %v4261_v18  ;;  %v4264_v51 = vadd.f32 %v7231_v35, %v4161_v10  ;;  %v4160_v17 = vadd.f32 %v4001_v53, %v3706_v54  ;;  %v3709_v49 = vadd.f32 %v5596_v48, %v3255_v27  ;;  %v4011_v37 = vpop.f32.mrf.mxu0  ;;  %v7676_v27 = vld [vmem:[#allocation34_spill] sm:$0xff] }
 0x1d4   : > { %v3557_v8 = vpop.f32.mrf.mxu1  ;;  %v3263_v18 = vadd.f32 %v7676_v27, %v2806_v16  ;;  %v7677_v48 = vld [vmem:[#allocation26_spill] sm:$0xff]  ;;  %v7689_v16 = vld [vmem:[#allocation28_spill] sm:$0xff] }
 0x1d5   : > { %4296 = vst [vmem:[%s7241_s9 + $0x48] sm:$0xff] %v4264_v51  ;;  %v4263_v39 = vadd.f32 %v7231_v35, %v4160_v17  ;;  %v4163_v56 = vadd.f32 %v5646_v14, %v3709_v49  ;;  %v3708_v57 = vadd.f32 %v3557_v8, %v3254_v62  ;;  %v5649_v38 = vpop.f32.mrf.mxu0  ;;  %v7678_v14 = vld [vmem:[#allocation11_spill] sm:$0xff] }
 0x1d6   : > { %v5599_v1 = vpop.f32.mrf.mxu1  ;;  %v2807_v62 = vadd.f32 %v7678_v14, %v7677_v48  ;;  %v7679_v49 = vld [vmem:[#allocation35_spill] sm:$0xff]  ;;  %v7696_v14 = vld [vmem:[#allocation29_spill] sm:$0xff] }
 0x1d7   : > { %4295 = vst [vmem:[%s7241_s9 + $0x40] sm:$0xff] %v4263_v39  ;;  %v4266_v22 = vadd.f32 %v7231_v35, %v4163_v56  ;;  %v4162_v29 = vadd.f32 %v4011_v37, %v3708_v57  ;;  %v3711_v9 = vadd.f32 %v5599_v1, %v3257_v28  ;;  %v4021_v58 = vpop.f32.mrf.mxu0  ;;  %v3262_v28 = vadd.f32 %v7679_v49, %v2805_v30  ;;  %v7682_v1 = vld [vmem:[#allocation38_spill] sm:$0xff] }
 0x1d8   : > { %v3567_v50 = vpop.f32.mrf.mxu1  ;;  %v3265_v39 = vadd.f32 %v7680_v63, %v2808_v21  ;;  %v7692_v30 = vld [vmem:[#allocation14_spill] sm:$0xff]  ;;  %v7694_v21 = vld [vmem:[#allocation17_spill] sm:$0xff] }
 0x1d9   : > { %4298 = vst [vmem:[%s7241_s9 + $0x58] sm:$0xff] %v4266_v22  ;;  %v4265_v3 = vadd.f32 %v7231_v35, %v4162_v29  ;;  %v4165_v34 = vadd.f32 %v5649_v38, %v3711_v9  ;;  %v3710_v20 = vadd.f32 %v3567_v50, %v3256_v52  ;;  %v5652_v7 = vpop.f32.mrf.mxu0  ;;  %v7681_v52 = vld [vmem:[#allocation27_spill] sm:$0xff]  ;;  %v7683_v9 = vld [vmem:[#allocation37_spill] sm:$0xff] }
 0x1da   : > { %v5602_v24 = vpop.f32.mrf.mxu1  ;;  %v2810_v38 = vadd.f32 %v7682_v1, %v7681_v52  ;;  %v3264_v33 = vadd.f32 %v7683_v9, %v2807_v62  ;;  %v7697_v62 = vld [vmem:[#allocation6_spill] sm:$0xff] }
 0x1db   : > { %4297 = vst [vmem:[%s7241_s9 + $0x50] sm:$0xff] %v4265_v3  ;;  %v4268_v55 = vadd.f32 %v7231_v35, %v4165_v34  ;;  %v4164_v46 = vadd.f32 %v4021_v58, %v3710_v20  ;;  %v3713_v31 = vadd.f32 %v5602_v24, %v3259_v60  ;;  %v4031_v4 = vpop.f32.mrf.mxu0  ;;  %v7684_v60 = vld [vmem:[#allocation41_spill] sm:$0xff]  ;;  %v7685_v3 = vld [vmem:[#allocation39_spill] sm:$0xff] }
 0x1dc   : > { %v3577_v15 = vpop.f32.mrf.mxu1  ;;  %v2809_v34 = vadd.f32 %v7685_v3, %v7684_v60 }
 0x1dd   : > { %4300 = vst [vmem:[%s7241_s9 + $0x68] sm:$0xff] %v4268_v55  ;;  %v4267_v36 = vadd.f32 %v7231_v35, %v4164_v46  ;;  %v4167_v43 = vadd.f32 %v5652_v7, %v3713_v31  ;;  %v3712_v19 = vadd.f32 %v3577_v15, %v3258_v45  ;;  %v5655_v12 = vpop.f32.mrf.mxu0  ;;  %v7686_v7 = vld [vmem:[#allocation42_spill] sm:$0xff]  ;;  %v7687_v45 = vld [vmem:[#allocation13_spill] sm:$0xff] }
 0x1de   : > { %v5605_v59 = vpop.f32.mrf.mxu1  ;;  %v2812_v55 = vadd.f32 %v7687_v45, %v7686_v7  ;;  %v7705_v45 = vld [vmem:[#allocation31_spill] sm:$0xff] }
 0x1df   : > { %4299 = vst [vmem:[%s7241_s9 + $0x60] sm:$0xff] %v4267_v36  ;;  %v4270_v41 = vadd.f32 %v7231_v35, %v4167_v43  ;;  %v4166_v44 = vadd.f32 %v4031_v4, %v3712_v19  ;;  %v3715_v47 = vadd.f32 %v5605_v59, %v3261_v6  ;;  %v4041_v53 = vpop.f32.mrf.mxu0  ;;  %v7688_v6 = vld [vmem:[#allocation12_spill] sm:$0xff]  ;;  %v7690_v36 = vld [vmem:[#allocation15_spill] sm:$0xff] }
 0x1e0   : > { %v3587_v32 = vpop.f32.mrf.mxu1  ;;  %v3267_v15 = vadd.f32 %v7688_v6, %v2810_v38  ;;  %v2811_v43 = vadd.f32 %v7690_v36, %v7689_v16  ;;  %v7708_v36 = vld [vmem:[#allocation32_spill] sm:$0xff] }
 0x1e1   : > { %4302 = vst [vmem:[%s7241_s9 + $0x78] sm:$0xff] %v4270_v41  ;;  %v4269_v10 = vadd.f32 %v7231_v35, %v4166_v44  ;;  %v4169_v54 = vadd.f32 %v5655_v12, %v3715_v47  ;;  %v3714_v25 = vadd.f32 %v3587_v32, %v3260_v2  ;;  %v5658_v17 = vpop.f32.mrf.mxu0  ;;  %v7691_v2 = vld [vmem:[#allocation40_spill] sm:$0xff]  ;;  %v3269_v41 = vadd.f32 %v7692_v30, %v2812_v55 }
 0x1e2   : > { %v5608_v51 = vpop.f32.mrf.mxu1  ;;  %v3266_v59 = vadd.f32 %v7691_v2, %v2809_v34  ;;  %v2814_v32 = vadd.f32 %v7694_v21, %v7693_v11  ;;  %v7706_v55 = vld [vmem:[#allocation44_spill] sm:$0xff] }
 0x1e3   : > { %4301 = vst [vmem:[%s7241_s9 + $0x70] sm:$0xff] %v4269_v10  ;;  %v4272_v13 = vadd.f32 %v7231_v35, %v4169_v54  ;;  %v4168_v8 = vadd.f32 %v4041_v53, %v3714_v25  ;;  %v3717_v37 = vadd.f32 %v5608_v51, %v3263_v18  ;;  %v4051_v57 = vpop.f32.mrf.mxu0  ;;  %v7695_v10 = vld [vmem:[#allocation43_spill] sm:$0xff]  ;;  %v2813_v51 = vadd.f32 %v7697_v62, %v7696_v14 }
 0x1e4   : > { %v3597_v56 = vpop.f32.mrf.mxu1  ;;  %v3268_v54 = vadd.f32 %v7695_v10, %v2811_v43  ;;  %v7709_v43 = vld [vmem:[#allocation46_spill] sm:$0xff] }
 0x1e5   : > { %4304 = vst [vmem:[%s7241_s9 + $0x88] sm:$0xff] %v4272_v13  ;;  %v4271_v40 = vadd.f32 %v7231_v35, %v4168_v8  ;;  %v4171_v22 = vadd.f32 %v5658_v17, %v3717_v37  ;;  %v3716_v29 = vadd.f32 %v3597_v56, %v3262_v28  ;;  %v5661_v58 = vpop.f32.mrf.mxu0  ;;  %v7698_v13 = vld [vmem:[#allocation30_spill] sm:$0xff]  ;;  %v7700_v56 = vld [vmem:[#allocation16_spill] sm:$0xff] }
 0x1e6   : > { %v5611_v50 = vpop.f32.mrf.mxu1  ;;  %v7699_v8 = vld [vmem:[#allocation18_spill] sm:$0xff] }
 0x1e7   : > { %4303 = vst [vmem:[%s7241_s9 + $0x80] sm:$0xff] %v4271_v40  ;;  %v4274_v20 = vadd.f32 %v7231_v35, %v4171_v22  ;;  %v4170_v0 = vadd.f32 %v4051_v57, %v3716_v29  ;;  %v3719_v24 = vadd.f32 %v5611_v50, %v3265_v39  ;;  %v4061_v31 = vpop.f32.mrf.mxu0  ;;  %v2816_v37 = vadd.f32 %v7699_v8, %v7698_v13  ;;  %v7701_v40 = vld [vmem:[#allocation8_spill] sm:$0xff]  ;;  %v7702_v22 = vld [vmem:[#allocation21_spill] sm:$0xff]  ;;  %v7703_v50 = vld [vmem:[#allocation19_spill] sm:$0xff] }
 0x1e8   : > { %v3607_v46 = vpop.f32.mrf.mxu1  ;;  %v3271_v57 = vadd.f32 %v7700_v56, %v2814_v32  ;;  %v2815_v29 = vadd.f32 %v7702_v22, %v7701_v40  ;;  %v7711_v32 = vld [vmem:[#allocation47_spill] sm:$0xff] }
 0x1e9   : > { %4306 = vst [vmem:[%s7241_s9 + $0x98] sm:$0xff] %v4274_v20  ;;  %v4273_v4 = vadd.f32 %v7231_v35, %v4170_v0  ;;  %v4173_v23 = vadd.f32 %v5661_v58, %v3719_v24  ;;  %v3718_v42 = vadd.f32 %v3607_v46, %v3264_v33  ;;  %v5664_v26 = vpop.f32.mrf.mxu0  ;;  %v3270_v58 = vadd.f32 %v7703_v50, %v2813_v51  ;;  %v7704_v20 = vld [vmem:[#allocation20_spill] sm:$0xff] }
 0x1ea   : > { %v5614_v19 = vpop.f32.mrf.mxu1  ;;  %v3273_v0 = vadd.f32 %v7704_v20, %v2816_v37  ;;  %v2818_v46 = vadd.f32 %v7706_v55, %v7705_v45 }
 0x1eb   : > { %4305 = vst [vmem:[%s7241_s9 + $0x90] sm:$0xff] %v4273_v4  ;;  %v4276_v12 = vadd.f32 %v7231_v35, %v4173_v23  ;;  %v4172_v61 = vadd.f32 %v4061_v31, %v3718_v42  ;;  %v3721_v5 = vadd.f32 %v5614_v19, %v3267_v15  ;;  %v4071_v47 = vpop.f32.mrf.mxu0  ;;  %v7707_v4 = vld [vmem:[#allocation22_spill] sm:$0xff]  ;;  %v2817_v19 = vadd.f32 %v7709_v43, %v7708_v36 }
 0x1ec   : > { %v3617_v44 = vpop.f32.mrf.mxu1  ;;  %v3272_v23 = vadd.f32 %v7707_v4, %v2815_v29 }
 0x1ed   : > { %4308 = vst [vmem:[%s7241_s9 + $0xa8] sm:$0xff] %v4276_v12  ;;  %v4275_v53 = vadd.f32 %v7231_v35, %v4172_v61  ;;  %v4175_v27 = vadd.f32 %v5664_v26, %v3721_v5  ;;  %v3720_v18 = vadd.f32 %v3617_v44, %v3266_v59  ;;  %v5667_v48 = vpop.f32.mrf.mxu0  ;;  %v7710_v5 = vld [vmem:[#allocation45_spill] sm:$0xff] }
 0x1ee   : > { %v5617_v25 = vpop.f32.mrf.mxu1  ;;  %v3275_v30 = vadd.f32 %v7710_v5, %v2818_v46 }
 0x1ef   : > { %4307 = vst [vmem:[%s7241_s9 + $0xa0] sm:$0xff] %v4275_v53  ;;  %v4278_v17 = vadd.f32 %v7231_v35, %v4175_v27  ;;  %v4174_v49 = vadd.f32 %v4071_v47, %v3720_v18  ;;  %v3723_v28 = vadd.f32 %v5617_v25, %v3269_v41  ;;  %v4081_v39 = vpop.f32.mrf.mxu0  ;;  %v3274_v53 = vadd.f32 %v7711_v32, %v2817_v19 }
 0x1f0   : > { %v3627_v63 = vpop.f32.mrf.mxu1 }
 0x1f1   : > { %4310 = vst [vmem:[%s7241_s9 + $0xb8] sm:$0xff] %v4278_v17  ;;  %v4277_v52 = vadd.f32 %v7231_v35, %v4174_v49  ;;  %v4177_v1 = vadd.f32 %v5667_v48, %v3723_v28  ;;  %v3722_v38 = vadd.f32 %v3627_v63, %v3268_v54  ;;  %v5670_v33 = vpop.f32.mrf.mxu0 }
 0x1f2   : > { %v5620_v9 = vpop.f32.mrf.mxu1 }
 0x1f3   : > { %4309 = vst [vmem:[%s7241_s9 + $0xb0] sm:$0xff] %v4277_v52  ;;  %v4280_v60 = vadd.f32 %v7231_v35, %v4177_v1  ;;  %v4176_v3 = vadd.f32 %v4081_v39, %v3722_v38  ;;  %v3725_v34 = vadd.f32 %v5620_v9, %v3271_v57  ;;  %v4091_v7 = vpop.f32.mrf.mxu0 }
 0x1f4   : > { %v3637_v24 = vpop.f32.mrf.mxu1 }
 0x1f5   : > { %4312 = vst [vmem:[%s7241_s9 + $0xc8] sm:$0xff] %v4280_v60  ;;  %v4279_v31 = vadd.f32 %v7231_v35, %v4176_v3  ;;  %v4179_v6 = vadd.f32 %v5670_v33, %v3725_v34  ;;  %v3724_v15 = vadd.f32 %v3637_v24, %v3270_v58  ;;  %v5673_v16 = vpop.f32.mrf.mxu0 }
 0x1f6   : > { %v5623_v42 = vpop.f32.mrf.mxu1 }
 0x1f7   : > { %4311 = vst [vmem:[%s7241_s9 + $0xc0] sm:$0xff] %v4279_v31  ;;  %v4282_v26 = vadd.f32 %v7231_v35, %v4179_v6  ;;  %v4178_v2 = vadd.f32 %v4091_v7, %v3724_v15  ;;  %v3727_v59 = vadd.f32 %v5623_v42, %v3273_v0  ;;  %v4101_v61 = vpop.f32.mrf.mxu0 }
 0x1f8   : > { %v3647_v12 = vpop.f32.mrf.mxu1 }
 0x1f9   : > { %4314 = vst [vmem:[%s7241_s9 + $0xd8] sm:$0xff] %v4282_v26  ;;  %v4281_v41 = vadd.f32 %v7231_v35, %v4178_v2  ;;  %v4181_v44 = vadd.f32 %v5673_v16, %v3727_v59  ;;  %v3726_v47 = vadd.f32 %v3647_v12, %v3272_v23  ;;  %v5676_v21 = vpop.f32.mrf.mxu0 }
 0x1fa   : > { %v5626_v11 = vpop.f32.mrf.mxu1 }
 0x1fb   : > { %4313 = vst [vmem:[%s7241_s9 + $0xd0] sm:$0xff] %v4281_v41  ;;  %v4284_v27 = vadd.f32 %v7231_v35, %v4181_v44  ;;  %v4180_v18 = vadd.f32 %v4101_v61, %v3726_v47  ;;  %v3729_v10 = vadd.f32 %v5626_v11, %v3275_v30  ;;  %v4111_v62 = vpop.f32.mrf.mxu0 }
 0x1fc   : > { %v3657_v54 = vpop.f32.mrf.mxu1 }
 0x1fd   : > { %4316 = vst [vmem:[%s7241_s9 + $0xe8] sm:$0xff] %v4284_v27  ;;  %v4283_v25 = vadd.f32 %v7231_v35, %v4180_v18  ;;  %v4183_v48 = vadd.f32 %v5676_v21, %v3729_v10  ;;  %v3728_v14 = vadd.f32 %v3657_v54, %v3274_v53 }
 0x1ff   : > { %4315 = vst [vmem:[%s7241_s9 + $0xe0] sm:$0xff] %v4283_v25  ;;  %v4286_v51 = vadd.f32 %v7231_v35, %v4183_v48  ;;  %v4182_v17 = vadd.f32 %v4111_v62, %v3728_v14 }
 0x201   : > { %4318 = vst [vmem:[%s7241_s9 + $0xf8] sm:$0xff] %v4286_v51  ;;  %v4285_v49 = vadd.f32 %v7231_v35, %v4182_v17 }
 0x203   : > { %4317 = vst [vmem:[%s7241_s9 + $0xf0] sm:$0xff] %v4285_v49 }
 0x204   : > { %5750 = shalt.err (!%p5747_p5)
}
 0x205   : > { %s5751_s29 = scalar_lea.hbm %s7385_s21, 4096  ;;  %s5755_s5 = scalar_lea.hbm %s7442_s3, 8192 }
 0x206   : > { %p5752_p6 = scmp.ne.s32.totalorder %s7385_s21, %s5751_s29  ;;  %p5756_p10 = scmp.lt.s32.totalorder %s7385_s21, %s7442_s3 }
 0x207   : > { %p5757_p11 = scmp.lt.s32.totalorder %s5755_s5, %s5751_s29 }
 0x208   : > { %p5753_p7 = pnand %p5752_p6, %p5878_p4 }
 0x209   : > { %p5758_p12 = por %p5757_p11, %p5756_p10 }
 0x20a   : > { %p5754_p9 = pneg %p5753_p7 }
 0x20c   : > { %p5759_p13 = pnand %p5758_p12, %p5754_p9 }
 0x20e   : > { %5762 = shalt.err (!%p5759_p13)
}
 0x20f   : > { %s5816_s8 = smov 128   ;;  %s5817_s9 = smov 8  }
 0x210   : > { %5680 = dma.vmem_to_hbm [thread:$0]  (%p5878_p4), %s7387_s11, 4096, %s7385_s21, %s7394_s15, %s5816_s8, %s5816_s8, %s5817_s9  }
 0x211 PF: > { %p5686_p0 = scmp.ge.s32.totalorder %s5813_s17, 2  ;;  %s4351_s10 = sand.u32 1, %s5793_s12  }
 0x212   : > { %s4352_s18 = scalar_lea.sflag [#allocation4], %s4351_s10 }
 0x213   : > { %p5683_p1 = pnand %p5686_p0, %p5885_p8 }
 0x215   : > { %p5684_p2 = pneg %p5683_p1 }
 0x217   : > { %5788 = dma.done.wait (%p5684_p2), %s4352_s18, 4096  }
 0x218   : > { %5790 = vsyncadd (%p5684_p2), %s4352_s18, 4294963200  ;;  %s16_s17 = sadd.s32 1, %s5813_s17   ;;  %s7712_s12 = smov %s5797_s13 }
 0x219   : > { %p13_p3 = scmp.ge.s32.totalorder %s16_s17, 4   ;;  %s7713_s13 = smov %s5801_s14 }
 0x21a   : > { %s7714_s14 = smov %s5891_s25  ;;  %s7715_s15 = smov %s5809_s16 }
 0x21b   : > { %s7716_s16 = smov %s7718_s20  ;;  %15 = sbr.rel (!%p13_p3) target bundleno = 4 (0x4), region = 78 }
 0x220   :  { %4357 = vsyncpa [#allocation4], 1 }
 0x221   :  { %4359 = vsyncpa [#allocation4 + $0x1], 1 }

</bundles_post_ra>
